<compile_context>
chip_gen: v7x
topology: tpu7x:2x2x1
jax: 0.10.0
libtpu: 0.0.40
codegen_flags: <defaults>
</compile_context>

<pallas_src>
import functools

import jax
import jax.numpy as jnp
from jax import lax
from jax.experimental import pallas as pl
from jax.experimental.pallas import tpu as pltpu

LANE = 128
TM_MAX = 512      # IoU kernel: (8, TM, 128) f32 block = 2 MiB, TM*128 boxes per grid step
TR_MAX = 1024     # focal kernel: max rows per grid step (also capped by a ~2 MiB budget)


def _pad_to(x, m):
    return ((x + m - 1) // m) * m


def _recip(x):
    """EUP approximate reciprocal + one Newton-Raphson refinement (~f32 accurate)."""
    r = pl.reciprocal(x, approx=True)
    return r * (2.0 - x * r)


# --------------------------------------------------------------------------------------
# Kernel 1: size-aware IoU loss, fused masked sum over boxes.
# --------------------------------------------------------------------------------------
def _iou_sum_kernel(b_ref, out_ref, *, n, tm, loss_type, size_aware_weight,
                    small_threshold, medium_threshold, weight_type):
    # b_ref block: (8, tm, 128); rows 0..3 = pred [cx,cy,w,h], 4..7 = target [cx,cy,w,h]
    pcx, pcy, pw, ph = b_ref[0], b_ref[1], b_ref[2], b_ref[3]
    tcx, tcy, tw, th = b_ref[4], b_ref[5], b_ref[6], b_ref[7]

    p_x1 = pcx - pw * 0.5
    p_x2 = pcx + pw * 0.5
    p_y1 = pcy - ph * 0.5
    p_y2 = pcy + ph * 0.5
    t_x1 = tcx - tw * 0.5
    t_x2 = tcx + tw * 0.5
    t_y1 = tcy - th * 0.5
    t_y2 = tcy + th * 0.5

    ix1 = jnp.maximum(p_x1, t_x1)
    iy1 = jnp.maximum(p_y1, t_y1)
    ix2 = jnp.minimum(p_x2, t_x2)
    iy2 = jnp.minimum(p_y2, t_y2)

    area_p = pw * ph
    area_g = tw * th
    en = ((ix1 < ix2) & (iy1 < iy2)).astype(jnp.float32)
    area_i = (ix2 - ix1) * (iy2 - iy1) * en
    area_u = area_p + area_g - area_i
    iou = area_i * _recip(area_u + 1e-16)

    if loss_type == "iou":
        loss = 1.0 - iou * iou
    elif loss_type == "giou":
        cx1 = jnp.minimum(p_x1, t_x1)
        cy1 = jnp.minimum(p_y1, t_y1)
        cx2 = jnp.maximum(p_x2, t_x2)
        cy2 = jnp.maximum(p_y2, t_y2)
        area_c = (cx2 - cx1) * (cy2 - cy1)
        giou = iou - (area_c - area_u) * _recip(jnp.maximum(area_c, 1e-16))
        loss = 1.0 - jnp.clip(giou, -1.0, 1.0)
    else:
        raise NotImplementedError(loss_type)

    # size-aware weights from target areas (SizeAwareIOULoss variant)
    areas = area_g
    W = size_aware_weight
    if weight_type == "exponential":
        w = jnp.clip(W * jnp.exp(areas * (-1.0 / small_threshold)), 1.0, W)
    elif weight_type == "step":
        w = jnp.ones_like(areas)
        w = jnp.where((areas > small_threshold) & (areas <= medium_threshold),
                      (W + 1.0) * 0.5, w)
        w = jnp.where(areas <= small_threshold, W, w)
    elif weight_type == "linear":
        norm = jnp.clip(areas * (1.0 / medium_threshold), 0.0, 1.0)
        w = jnp.clip(W * (1.0 - norm) + 1.0, 1.0, W)
    else:
        raise ValueError(weight_type)

    # mask out padded boxes and reduce over sublanes -> lane-dense (1, 128) partial sum
    rows = lax.broadcasted_iota(jnp.int32, (tm, LANE), 0) + pl.program_id(0) * tm
    cols = lax.broadcasted_iota(jnp.int32, (tm, LANE), 1)
    valid = ((rows * LANE + cols) < n).astype(jnp.float32)

    partial = jnp.sum(loss * w * valid, axis=0, keepdims=True)      # (1, 128)
    out_ref[...] = partial.reshape(1, 1, LANE)


def _size_aware_iou_sum(pred, target, *, loss_type, size_aware_weight, small_threshold,
                        medium_threshold, weight_type):
    pred = jnp.asarray(pred, jnp.float32).reshape(-1, 4)
    target = jnp.asarray(target, jnp.float32).reshape(-1, 4)
    n = pred.shape[0]
    npad = _pad_to(max(n, 1), LANE)
    m = npad // LANE
    tm = min(TM_MAX, m)
    mpad = _pad_to(m, tm)

    # coordinate-major packing: (8, Mpad, 128), boxes live on the lane axis.
    # TODO(synk): this packing pass is a separate XLA fusion; callers that can supply a
    # pre-packed (8, M, 128) slab avoid one HBM round-trip.
    boxes = jnp.concatenate([pred.T, target.T], axis=0)              # (8, N)
    boxes = jnp.pad(boxes, ((0, 0), (0, npad - n))).reshape(8, m, LANE)
    if mpad != m:
        boxes = jnp.pad(boxes, ((0, 0), (0, mpad - m), (0, 0)))

    grid = mpad // tm
    kernel = functools.partial(
        _iou_sum_kernel, n=n, tm=tm, loss_type=loss_type,
        size_aware_weight=float(size_aware_weight),
        small_threshold=float(small_threshold),
        medium_threshold=float(medium_threshold),
        weight_type=weight_type)

    partials = pl.pallas_call(
        kernel,
        out_shape=jax.ShapeDtypeStruct((grid, 1, LANE), jnp.float32),
        grid_spec=pltpu.PrefetchScalarGridSpec(
            num_scalar_prefetch=0,
            grid=(grid,),
            in_specs=[pl.BlockSpec((8, tm, LANE), lambda i: (0, i, 0))],
            out_specs=pl.BlockSpec((1, 1, LANE), lambda i: (i, 0, 0)),
        ),
        compiler_params=pltpu.CompilerParams(dimension_semantics=("parallel",)),
    )(boxes)
    return jnp.sum(partials)


# --------------------------------------------------------------------------------------
# Kernel 2: size-aware focal loss + objectness BCE, fused masked sums.
# --------------------------------------------------------------------------------------
def _focal_obj_kernel(x_ref, tgt_ref, area_ref, obj_ref, out_f_ref, out_o_ref, *,
                      n, c, tr, cpad, alpha, gamma, size_aware_weight, small_threshold,
                      weight_type):
    x = x_ref[...]                          # (tr, cpad) logits
    tgt = tgt_ref[...]                      # (tr, 1)   int32 class index
    areas = area_ref[...]                   # (tr, 1)   target box areas
    xo = obj_ref[...]                       # (tr, 1)   objectness logits

    row0 = pl.program_id(0) * tr
    rows = lax.broadcasted_iota(jnp.int32, (tr, cpad), 0) + row0
    cols = lax.broadcasted_iota(jnp.int32, (tr, cpad), 1)
    valid = ((rows < n) & (cols < c)).astype(jnp.float32)

    y = jnp.where(cols == tgt, 1.0, 0.0)                    # one-hot
    p = 1.0 / (1.0 + jnp.exp(-x))                           # sigmoid
    pt = p * y + (1.0 - p) * (1.0 - y)
    alpha_t = alpha * y + (1.0 - alpha) * (1.0 - y)
    one_m_pt = 1.0 - pt
    if float(gamma) == 2.0:
        mod = one_m_pt * one_m_pt
    else:
        mod = jnp.power(jnp.maximum(one_m_pt, 0.0), gamma)
    focal_w = alpha_t * mod
    # numerically stable BCE-with-logits
    bce = jnp.maximum(x, 0.0) - x * y + jnp.log(1.0 + jnp.exp(-jnp.abs(x)))

    # size-aware weights (SizeAwareFocalLoss variant)
    W = size_aware_weight
    if weight_type == "exponential":
        w = jnp.clip(W * jnp.exp(areas * (-1.0 / small_threshold)), 1.0, W)
    elif weight_type == "step":
        w = jnp.where(areas <= small_threshold, W, 1.0)
    elif weight_type == "linear":
        norm = jnp.clip(areas * (1.0 / (small_threshold * 3.0)), 0.0, 1.0)
        w = W * (1.0 - norm) + 1.0
    else:
        raise ValueError(weight_type)

    contrib = focal_w * bce * w * valid                     # (tr, cpad)
    out_f_ref[...] = jnp.sum(contrib, axis=0, keepdims=True).reshape(1, 1, cpad)

    # objectness: BCE(xo, 1) = softplus(-xo), masked per-row
    row_valid = ((lax.broadcasted_iota(jnp.int32, (tr, 1), 0) + row0) < n).astype(jnp.float32)
    obj_bce = jnp.maximum(-xo, 0.0) + jnp.log(1.0 + jnp.exp(-jnp.abs(xo)))
    out_o_ref[...] = jnp.sum(obj_bce * row_valid, axis=0, keepdims=True).reshape(1, 1, 1)


def _size_aware_focal_obj_sums(pred_cls, target_cls, target_boxes, pred_obj, *,
                               alpha, gamma, size_aware_weight, small_threshold,
                               weight_type):
    pred_cls = jnp.asarray(pred_cls, jnp.float32)
    n, c = pred_cls.shape
    target_cls = jnp.asarray(target_cls, jnp.int32).reshape(n, 1)
    tb = jnp.asarray(target_boxes, jnp.float32).reshape(-1, 4)
    areas = tb[:, 2:3] * tb[:, 3:4]                                  # (n, 1)
    pred_obj = jnp.asarray(pred_obj, jnp.float32).reshape(n, 1)

    cpad = _pad_to(c, LANE)
    nr8 = _pad_to(n, 8)
    row_budget = max(8, (((2 * 1024 * 1024) // (cpad * 4)) // 8) * 8)
    tr = min(TR_MAX, row_budget, nr8)
    nrpad = _pad_to(nr8, tr)

    logits = jnp.pad(pred_cls, ((0, nrpad - n), (0, cpad - c)))
    tgt = jnp.pad(target_cls, ((0, nrpad - n), (0, 0)))
    ar = jnp.pad(areas, ((0, nrpad - n), (0, 0)))
    obj = jnp.pad(pred_obj, ((0, nrpad - n), (0, 0)))

    grid = nrpad // tr
    kernel = functools.partial(
        _focal_obj_kernel, n=n, c=c, tr=tr, cpad=cpad, alpha=float(alpha),
        gamma=float(gamma), size_aware_weight=float(size_aware_weight),
        small_threshold=float(small_threshold), weight_type=weight_type)

    focal_part, obj_part = pl.pallas_call(
        kernel,
        out_shape=(jax.ShapeDtypeStruct((grid, 1, cpad), jnp.float32),
                   jax.ShapeDtypeStruct((grid, 1, 1), jnp.float32)),
        grid_spec=pltpu.PrefetchScalarGridSpec(
            num_scalar_prefetch=0,
            grid=(grid,),
            in_specs=[pl.BlockSpec((tr, cpad), lambda i: (i, 0)),
                      pl.BlockSpec((tr, 1), lambda i: (i, 0)),
                      pl.BlockSpec((tr, 1), lambda i: (i, 0)),
                      pl.BlockSpec((tr, 1), lambda i: (i, 0))],
            out_specs=[pl.BlockSpec((1, 1, cpad), lambda i: (i, 0, 0)),
                       pl.BlockSpec((1, 1, 1), lambda i: (i, 0, 0))],
        ),
        compiler_params=pltpu.CompilerParams(dimension_semantics=("parallel",)),
    )(logits, tgt, ar, obj)
    return jnp.sum(focal_part), jnp.sum(obj_part)


# --------------------------------------------------------------------------------------
# SizeAwareLossWrapper.forward
# --------------------------------------------------------------------------------------
@functools.partial(jax.jit, static_argnames=(
    "use_size_aware", "size_aware_weight", "small_threshold", "medium_threshold",
    "weight_type", "loss_type", "alpha", "gamma"))
def size_aware_loss_wrapper(pred_reg, pred_cls, pred_obj, target_reg, target_cls,
                            target_boxes, *, use_size_aware=True, size_aware_weight=2.0,
                            small_threshold=1024.0, medium_threshold=9216.0,
                            weight_type="exponential", loss_type="iou",
                            alpha=0.25, gamma=2.0):
    if not use_size_aware:
        # TODO(synk): use_size_aware=False depends on external IOUloss / nn.CrossEntropyLoss.
        raise NotImplementedError("only the size-aware path is implemented")

    pred_reg = jnp.asarray(pred_reg, jnp.float32).reshape(-1, 4)
    target_reg = jnp.asarray(target_reg, jnp.float32).reshape(-1, 4)
    n = pred_reg.shape[0]
    num_classes = pred_cls.shape[-1]

    iou_sum = _size_aware_iou_sum(
        pred_reg, target_reg, loss_type=loss_type, size_aware_weight=size_aware_weight,
        small_threshold=small_threshold, medium_threshold=medium_threshold,
        weight_type=weight_type)
    iou_loss = iou_sum / n

    focal_sum, obj_sum = _size_aware_focal_obj_sums(
        pred_cls, target_cls, target_boxes, pred_obj, alpha=alpha, gamma=gamma,
        size_aware_weight=size_aware_weight, small_threshold=small_threshold,
        weight_type=weight_type)
    cls_loss = focal_sum / (n * num_classes)
    obj_loss = obj_sum / n

    total_loss = iou_loss + cls_loss + obj_loss
    return {"iou_loss": iou_loss, "cls_loss": cls_loss,
            "obj_loss": obj_loss, "total_loss": total_loss}


# --------------------------------------------------------------------------------------
# Pure-JAX reference mirroring the PyTorch modules
# --------------------------------------------------------------------------------------
def _ref_wrapper(pred_reg, pred_cls, pred_obj, target_reg, target_cls, target_boxes, *,
                 size_aware_weight=2.0, small_threshold=1024.0, medium_threshold=9216.0,
                 weight_type="exponential", loss_type="iou", alpha=0.25, gamma=2.0):
    W = size_aware_weight
    pred = pred_reg.reshape(-1, 4)
    target = target_reg.reshape(-1, 4)

    # SizeAwareIOULoss
    areas = target[:, 2] * target[:, 3]
    if weight_type == "exponential":
        w = jnp.clip(W * jnp.exp(-areas / small_threshold), 1.0, W)
    elif weight_type == "step":
        w = jnp.ones_like(areas)
        w = jnp.where((areas > small_threshold) & (areas <= medium_threshold),
                      (W + 1.0) / 2.0, w)
        w = jnp.where(areas <= small_threshold, W, w)
    else:  # linear
        norm = jnp.clip(areas / medium_threshold, 0.0, 1.0)
        w = jnp.clip(W * (1.0 - norm) + 1.0, 1.0, W)
    ptl = pred[:, :2] - pred[:, 2:] / 2
    pbr = pred[:, :2] + pred[:, 2:] / 2
    ttl = target[:, :2] - target[:, 2:] / 2
    tbr = target[:, :2] + target[:, 2:] / 2
    tl = jnp.maximum(ptl, ttl)
    br = jnp.minimum(pbr, tbr)
    area_p = jnp.prod(pred[:, 2:], 1)
    area_g = jnp.prod(target[:, 2:], 1)
    en = jnp.prod((tl < br).astype(jnp.float32), 1)
    area_i = jnp.prod(br - tl, 1) * en
    area_u = area_p + area_g - area_i
    iou = area_i / (area_u + 1e-16)
    if loss_type == "iou":
        loss = 1.0 - iou ** 2
    else:  # giou
        ctl = jnp.minimum(ptl, ttl)
        cbr = jnp.maximum(pbr, tbr)
        area_c = jnp.prod(cbr - ctl, 1)
        giou = iou - (area_c - area_u) / jnp.maximum(area_c, 1e-16)
        loss = 1.0 - jnp.clip(giou, -1.0, 1.0)
    iou_loss = (loss * w).mean()

    # SizeAwareFocalLoss
    tb = target_boxes.reshape(-1, 4)
    fareas = tb[:, 2] * tb[:, 3]
    if weight_type == "exponential":
        sw = jnp.clip(W * jnp.exp(-fareas / small_threshold), 1.0, W)
    elif weight_type == "step":
        sw = jnp.where(fareas <= small_threshold, W, 1.0)
    else:  # linear
        norm = jnp.clip(fareas / (small_threshold * 3.0), 0.0, 1.0)
        sw = W * (1.0 - norm) + 1.0
    C = pred_cls.shape[1]
    x = pred_cls
    p = jax.nn.sigmoid(x)
    y = jax.nn.one_hot(target_cls, C, dtype=jnp.float32)
    pt = p * y + (1 - p) * (1 - y)
    at = alpha * y + (1 - alpha) * (1 - y)
    fw = at * (1.0 - pt) ** gamma
    bce = jnp.maximum(x, 0.0) - x * y + jnp.log1p(jnp.exp(-jnp.abs(x)))
    cls_loss = (fw * bce * sw[:, None]).mean()

    # objectness BCE with all-ones target
    xo = pred_obj
    obj_loss = (jnp.maximum(-xo, 0.0) + jnp.log1p(jnp.exp(-jnp.abs(xo)))).mean()

    total = iou_loss + cls_loss + obj_loss
    return {"iou_loss": iou_loss, "cls_loss": cls_loss,
            "obj_loss": obj_loss, "total_loss": total}


if __name__ == "__main__":
    key = jax.random.PRNGKey(0)
    ks = jax.random.split(key, 8)
    N, C = 83, 7   # non-multiple of 8/128 to exercise in-kernel padding masks

    pred_centers = jax.random.uniform(ks[0], (N, 2), jnp.float32, 0.0, 200.0)
    pred_wh = jax.random.uniform(ks[1], (N, 2), jnp.float32, 5.0, 80.0)
    targ_centers = pred_centers + jax.random.uniform(ks[2], (N, 2), jnp.float32, -5.0, 5.0)
    targ_wh = pred_wh + jax.random.uniform(ks[3], (N, 2), jnp.float32, -4.0, 4.0)
    pred_reg = jnp.concatenate([pred_centers, pred_wh], axis=1)
    target_reg = jnp.concatenate([targ_centers, targ_wh], axis=1)
    target_boxes = jnp.concatenate(
        [targ_centers,
         jnp.maximum(targ_wh + jax.random.uniform(ks[4], (N, 2), jnp.float32, -2.0, 2.0), 1.0)],
        axis=1)
    pred_cls = 2.0 * jax.random.normal(ks[5], (N, C), jnp.float32)
    target_cls = jax.random.randint(ks[6], (N,), 0, C, jnp.int32)
    pred_obj = jax.random.normal(ks[7], (N, 1), jnp.float32)

    configs = [
        dict(loss_type="iou", weight_type="exponential"),   # module defaults
        dict(loss_type="giou", weight_type="step"),
        dict(loss_type="iou", weight_type="linear"),
    ]
    for cfg in configs:
        out = size_aware_loss_wrapper(pred_reg, pred_cls, pred_obj, target_reg,
                                      target_cls, target_boxes, **cfg)
        out = {k: jax.block_until_ready(v) for k, v in out.items()}
        ref = _ref_wrapper(pred_reg, pred_cls, pred_obj, target_reg, target_cls,
                           target_boxes, **cfg)
        for name in ("iou_loss", "cls_loss", "obj_loss", "total_loss"):
            assert jnp.allclose(out[name], ref[name], atol=1e-3, rtol=1e-3), (
                cfg, name, out[name], ref[name])

    print("KERNEL_OK")
</pallas_src>

<mosaic_0001>
module attributes {stable_mosaic.version = 11 : i64} {
  func.func @_iou_sum_kernel(%arg0: i32, %arg1: memref<8x1x128xf32, #tpu.memory_space<vmem>>, %arg2: memref<1x1x128xf32, #tpu.memory_space<vmem>>) attributes {dimension_semantics = [#tpu.dimension_semantics<parallel>], iteration_bounds = array<i64: 1>, scalar_prefetch = 0 : i64, scratch_operands = 0 : i64, tpu.core_type = #tpu.core_type<tc>, window_params = [{transform_indices = @transform_0, window_bounds = array<i64: 8, 1, 128>}, {transform_indices = @transform_1, window_bounds = array<i64: 1, 1, 128>}]} {
    %c0 = arith.constant 0 : index
    %c0_0 = arith.constant 0 : index
    %c0_1 = arith.constant 0 : index
    %0 = vector.load %arg1[%c0, %c0_0, %c0_1] : memref<8x1x128xf32, #tpu.memory_space<vmem>>, vector<1x1x128xf32>
    %1 = vector.shape_cast %0 : vector<1x1x128xf32> to vector<1x128xf32>
    %c1 = arith.constant 1 : index
    %c0_2 = arith.constant 0 : index
    %c0_3 = arith.constant 0 : index
    %2 = vector.load %arg1[%c1, %c0_2, %c0_3] : memref<8x1x128xf32, #tpu.memory_space<vmem>>, vector<1x1x128xf32>
    %3 = vector.shape_cast %2 : vector<1x1x128xf32> to vector<1x128xf32>
    %c2 = arith.constant 2 : index
    %c0_4 = arith.constant 0 : index
    %c0_5 = arith.constant 0 : index
    %4 = vector.load %arg1[%c2, %c0_4, %c0_5] : memref<8x1x128xf32, #tpu.memory_space<vmem>>, vector<1x1x128xf32>
    %5 = vector.shape_cast %4 : vector<1x1x128xf32> to vector<1x128xf32>
    %c3 = arith.constant 3 : index
    %c0_6 = arith.constant 0 : index
    %c0_7 = arith.constant 0 : index
    %6 = vector.load %arg1[%c3, %c0_6, %c0_7] : memref<8x1x128xf32, #tpu.memory_space<vmem>>, vector<1x1x128xf32>
    %7 = vector.shape_cast %6 : vector<1x1x128xf32> to vector<1x128xf32>
    %c4 = arith.constant 4 : index
    %c0_8 = arith.constant 0 : index
    %c0_9 = arith.constant 0 : index
    %8 = vector.load %arg1[%c4, %c0_8, %c0_9] : memref<8x1x128xf32, #tpu.memory_space<vmem>>, vector<1x1x128xf32>
    %9 = vector.shape_cast %8 : vector<1x1x128xf32> to vector<1x128xf32>
    %c5 = arith.constant 5 : index
    %c0_10 = arith.constant 0 : index
    %c0_11 = arith.constant 0 : index
    %10 = vector.load %arg1[%c5, %c0_10, %c0_11] : memref<8x1x128xf32, #tpu.memory_space<vmem>>, vector<1x1x128xf32>
    %11 = vector.shape_cast %10 : vector<1x1x128xf32> to vector<1x128xf32>
    %c6 = arith.constant 6 : index
    %c0_12 = arith.constant 0 : index
    %c0_13 = arith.constant 0 : index
    %12 = vector.load %arg1[%c6, %c0_12, %c0_13] : memref<8x1x128xf32, #tpu.memory_space<vmem>>, vector<1x1x128xf32>
    %13 = vector.shape_cast %12 : vector<1x1x128xf32> to vector<1x128xf32>
    %c7 = arith.constant 7 : index
    %c0_14 = arith.constant 0 : index
    %c0_15 = arith.constant 0 : index
    %14 = vector.load %arg1[%c7, %c0_14, %c0_15] : memref<8x1x128xf32, #tpu.memory_space<vmem>>, vector<1x1x128xf32>
    %15 = vector.shape_cast %14 : vector<1x1x128xf32> to vector<1x128xf32>
    %cst = arith.constant 5.000000e-01 : f32
    %16 = vector.broadcast %cst : f32 to vector<1x128xf32>
    %17 = arith.mulf %5, %16 : vector<1x128xf32>
    %18 = arith.subf %1, %17 : vector<1x128xf32>
    %cst_16 = arith.constant 5.000000e-01 : f32
    %19 = vector.broadcast %cst_16 : f32 to vector<1x128xf32>
    %20 = arith.mulf %5, %19 : vector<1x128xf32>
    %21 = arith.addf %1, %20 : vector<1x128xf32>
    %cst_17 = arith.constant 5.000000e-01 : f32
    %22 = vector.broadcast %cst_17 : f32 to vector<1x128xf32>
    %23 = arith.mulf %7, %22 : vector<1x128xf32>
    %24 = arith.subf %3, %23 : vector<1x128xf32>
    %cst_18 = arith.constant 5.000000e-01 : f32
    %25 = vector.broadcast %cst_18 : f32 to vector<1x128xf32>
    %26 = arith.mulf %7, %25 : vector<1x128xf32>
    %27 = arith.addf %3, %26 : vector<1x128xf32>
    %cst_19 = arith.constant 5.000000e-01 : f32
    %28 = vector.broadcast %cst_19 : f32 to vector<1x128xf32>
    %29 = arith.mulf %13, %28 : vector<1x128xf32>
    %30 = arith.subf %9, %29 : vector<1x128xf32>
    %cst_20 = arith.constant 5.000000e-01 : f32
    %31 = vector.broadcast %cst_20 : f32 to vector<1x128xf32>
    %32 = arith.mulf %13, %31 : vector<1x128xf32>
    %33 = arith.addf %9, %32 : vector<1x128xf32>
    %cst_21 = arith.constant 5.000000e-01 : f32
    %34 = vector.broadcast %cst_21 : f32 to vector<1x128xf32>
    %35 = arith.mulf %15, %34 : vector<1x128xf32>
    %36 = arith.subf %11, %35 : vector<1x128xf32>
    %cst_22 = arith.constant 5.000000e-01 : f32
    %37 = vector.broadcast %cst_22 : f32 to vector<1x128xf32>
    %38 = arith.mulf %15, %37 : vector<1x128xf32>
    %39 = arith.addf %11, %38 : vector<1x128xf32>
    %40 = arith.maximumf %18, %30 : vector<1x128xf32>
    %41 = arith.maximumf %24, %36 : vector<1x128xf32>
    %42 = arith.minimumf %21, %33 : vector<1x128xf32>
    %43 = arith.minimumf %27, %39 : vector<1x128xf32>
    %44 = arith.mulf %5, %7 : vector<1x128xf32>
    %45 = arith.mulf %13, %15 : vector<1x128xf32>
    %46 = arith.cmpf olt, %40, %42 : vector<1x128xf32>
    %47 = arith.cmpf olt, %41, %43 : vector<1x128xf32>
    %48 = arith.andi %46, %47 : vector<1x128xi1>
    %49 = arith.extui %48 : vector<1x128xi1> to vector<1x128xi32>
    %50 = arith.sitofp %49 : vector<1x128xi32> to vector<1x128xf32>
    %51 = arith.subf %42, %40 : vector<1x128xf32>
    %52 = arith.subf %43, %41 : vector<1x128xf32>
    %53 = arith.mulf %51, %52 : vector<1x128xf32>
    %54 = arith.mulf %53, %50 : vector<1x128xf32>
    %55 = arith.addf %44, %45 : vector<1x128xf32>
    %56 = arith.subf %55, %54 : vector<1x128xf32>
    %cst_23 = arith.constant 1.000000e-16 : f32
    %57 = vector.broadcast %cst_23 : f32 to vector<1x128xf32>
    %58 = arith.addf %56, %57 : vector<1x128xf32>
    %59 = tpu.reciprocal %58 {approx = true} : vector<1x128xf32> -> vector<1x128xf32>
    %60 = arith.mulf %58, %59 : vector<1x128xf32>
    %cst_24 = arith.constant 2.000000e+00 : f32
    %61 = vector.broadcast %cst_24 : f32 to vector<1x128xf32>
    %62 = arith.subf %61, %60 : vector<1x128xf32>
    %63 = arith.mulf %59, %62 : vector<1x128xf32>
    %64 = arith.mulf %54, %63 : vector<1x128xf32>
    %65 = arith.mulf %64, %64 : vector<1x128xf32>
    %cst_25 = arith.constant 1.000000e+00 : f32
    %66 = vector.broadcast %cst_25 : f32 to vector<1x128xf32>
    %67 = arith.subf %66, %65 : vector<1x128xf32>
    %cst_26 = arith.constant -9.765625E-4 : f32
    %68 = vector.broadcast %cst_26 : f32 to vector<1x128xf32>
    %69 = arith.mulf %45, %68 : vector<1x128xf32>
    %70 = math.exp %69 : vector<1x128xf32>
    %cst_27 = arith.constant 2.000000e+00 : f32
    %71 = vector.broadcast %cst_27 : f32 to vector<1x128xf32>
    %72 = arith.mulf %71, %70 : vector<1x128xf32>
    %cst_28 = arith.constant 1.000000e+00 : f32
    %cst_29 = arith.constant 2.000000e+00 : f32
    %73 = vector.broadcast %cst_28 : f32 to vector<1x128xf32>
    %74 = arith.maximumf %73, %72 : vector<1x128xf32>
    %75 = vector.broadcast %cst_29 : f32 to vector<1x128xf32>
    %76 = arith.minimumf %75, %74 : vector<1x128xf32>
    %77 = tpu.iota {dimensions = array<i32: 0>} : vector<1x128xi32>
    %c1_i32 = arith.constant 1 : i32
    %78 = arith.muli %arg0, %c1_i32 : i32
    %79 = vector.broadcast %78 : i32 to vector<1x128xi32>
    %80 = arith.addi %77, %79 : vector<1x128xi32>
    %81 = tpu.iota {dimensions = array<i32: 1>} : vector<1x128xi32>
    %c128_i32 = arith.constant 128 : i32
    %82 = vector.broadcast %c128_i32 : i32 to vector<1x128xi32>
    %83 = arith.muli %80, %82 : vector<1x128xi32>
    %84 = arith.addi %83, %81 : vector<1x128xi32>
    %c83_i32 = arith.constant 83 : i32
    %85 = vector.broadcast %c83_i32 : i32 to vector<1x128xi32>
    %86 = arith.cmpi slt, %84, %85 : vector<1x128xi32>
    %87 = arith.extui %86 : vector<1x128xi1> to vector<1x128xi32>
    %88 = arith.sitofp %87 : vector<1x128xi32> to vector<1x128xf32>
    %89 = arith.mulf %67, %76 : vector<1x128xf32>
    %90 = arith.mulf %89, %88 : vector<1x128xf32>
    %cst_30 = arith.constant dense<0.000000e+00> : vector<128xf32>
    %91 = vector.multi_reduction <add>, %90, %cst_30 [0] : vector<1x128xf32> to vector<128xf32>
    %92 = vector.shape_cast %91 : vector<128xf32> to vector<1x128xf32>
    %93 = vector.shape_cast %92 : vector<1x128xf32> to vector<1x1x128xf32>
    %c0_31 = arith.constant 0 : index
    %c0_32 = arith.constant 0 : index
    %c0_33 = arith.constant 0 : index
    %94 = vector.load %arg2[%c0_31, %c0_32, %c0_33] : memref<1x1x128xf32, #tpu.memory_space<vmem>>, vector<1x1x128xf32>
    tpu.vector_store %arg2[%c0_31, %c0_32, %c0_33], %93 {strides = array<i32>} : memref<1x1x128xf32, #tpu.memory_space<vmem>>, vector<1x1x128xf32>,
    return
  }
  func.func @transform_0(%arg0: i32) -> (i32, i32, i32) {
    %c0_i32 = arith.constant 0 : i32
    %c0_i32_0 = arith.constant 0 : i32
    %c0_i32_1 = arith.constant 0 : i32
    return %c0_i32, %arg0, %c0_i32_0 : i32, i32, i32
  }
  func.func @transform_1(%arg0: i32) -> (i32, i32, i32) {
    %c0_i32 = arith.constant 0 : i32
    %c0_i32_0 = arith.constant 0 : i32
    %c0_i32_1 = arith.constant 0 : i32
    return %arg0, %c0_i32, %c0_i32_0 : i32, i32, i32
  }
}

module attributes {stable_mosaic.version = 11 : i64} {
  func.func @_focal_obj_kernel(%arg0: i32, %arg1: memref<88x128xf32, #tpu.memory_space<vmem>>, %arg2: memref<88x1xi32, #tpu.memory_space<vmem>>, %arg3: memref<88x1xf32, #tpu.memory_space<vmem>>, %arg4: memref<88x1xf32, #tpu.memory_space<vmem>>, %arg5: memref<1x1x128xf32, #tpu.memory_space<vmem>>, %arg6: memref<1x1x1xf32, #tpu.memory_space<vmem>>) attributes {dimension_semantics = [#tpu.dimension_semantics<parallel>], iteration_bounds = array<i64: 1>, scalar_prefetch = 0 : i64, scratch_operands = 0 : i64, tpu.core_type = #tpu.core_type<tc>, window_params = [{transform_indices = @transform_0, window_bounds = array<i64: 88, 128>}, {transform_indices = @transform_1, window_bounds = array<i64: 88, 1>}, {transform_indices = @transform_2, window_bounds = array<i64: 88, 1>}, {transform_indices = @transform_3, window_bounds = array<i64: 88, 1>}, {transform_indices = @transform_4, window_bounds = array<i64: 1, 1, 128>}, {transform_indices = @transform_5, window_bounds = array<i64: 1, 1, 1>}]} {
    %c0 = arith.constant 0 : index
    %c0_0 = arith.constant 0 : index
    %0 = vector.load %arg1[%c0, %c0_0] : memref<88x128xf32, #tpu.memory_space<vmem>>, vector<88x128xf32>
    %c0_1 = arith.constant 0 : index
    %c0_2 = arith.constant 0 : index
    %1 = vector.load %arg2[%c0_1, %c0_2] : memref<88x1xi32, #tpu.memory_space<vmem>>, vector<88x1xi32>
    %c0_3 = arith.constant 0 : index
    %c0_4 = arith.constant 0 : index
    %2 = vector.load %arg3[%c0_3, %c0_4] : memref<88x1xf32, #tpu.memory_space<vmem>>, vector<88x1xf32>
    %c0_5 = arith.constant 0 : index
    %c0_6 = arith.constant 0 : index
    %3 = vector.load %arg4[%c0_5, %c0_6] : memref<88x1xf32, #tpu.memory_space<vmem>>, vector<88x1xf32>
    %c88_i32 = arith.constant 88 : i32
    %4 = arith.muli %arg0, %c88_i32 : i32
    %5 = tpu.iota {dimensions = array<i32: 0>} : vector<88x128xi32>
    %6 = vector.broadcast %4 : i32 to vector<88x128xi32>
    %7 = arith.addi %5, %6 : vector<88x128xi32>
    %8 = tpu.iota {dimensions = array<i32: 1>} : vector<88x128xi32>
    %c83_i32 = arith.constant 83 : i32
    %9 = vector.broadcast %c83_i32 : i32 to vector<88x128xi32>
    %10 = arith.cmpi slt, %7, %9 : vector<88x128xi32>
    %c7_i32 = arith.constant 7 : i32
    %11 = vector.broadcast %c7_i32 : i32 to vector<88x128xi32>
    %12 = arith.cmpi slt, %8, %11 : vector<88x128xi32>
    %13 = arith.andi %10, %12 : vector<88x128xi1>
    %14 = arith.extui %13 : vector<88x128xi1> to vector<88x128xi32>
    %15 = arith.sitofp %14 : vector<88x128xi32> to vector<88x128xf32>
    %16 = vector.broadcast %1 : vector<88x1xi32> to vector<88x128xi32>
    %17 = arith.cmpi eq, %8, %16 : vector<88x128xi32>
    %cst = arith.constant 1.000000e+00 : f32
    %cst_7 = arith.constant 0.000000e+00 : f32
    %18 = vector.broadcast %cst : f32 to vector<88x128xf32>
    %19 = vector.broadcast %cst_7 : f32 to vector<88x128xf32>
    %20 = arith.select %17, %18, %19 : vector<88x128xi1>, vector<88x128xf32>
    %cst_8 = arith.constant 0.000000e+00 : f32
    %21 = vector.broadcast %cst_8 : f32 to vector<88x128xf32>
    %22 = arith.subf %21, %0 : vector<88x128xf32>
    %23 = math.exp %22 : vector<88x128xf32>
    %cst_9 = arith.constant 1.000000e+00 : f32
    %24 = vector.broadcast %cst_9 : f32 to vector<88x128xf32>
    %25 = arith.addf %24, %23 : vector<88x128xf32>
    %cst_10 = arith.constant 1.000000e+00 : f32
    %26 = vector.broadcast %cst_10 : f32 to vector<88x128xf32>
    %27 = arith.divf %26, %25 : vector<88x128xf32>
    %28 = arith.mulf %27, %20 : vector<88x128xf32>
    %cst_11 = arith.constant 1.000000e+00 : f32
    %29 = vector.broadcast %cst_11 : f32 to vector<88x128xf32>
    %30 = arith.subf %29, %27 : vector<88x128xf32>
    %cst_12 = arith.constant 1.000000e+00 : f32
    %31 = vector.broadcast %cst_12 : f32 to vector<88x128xf32>
    %32 = arith.subf %31, %20 : vector<88x128xf32>
    %33 = arith.mulf %30, %32 : vector<88x128xf32>
    %34 = arith.addf %28, %33 : vector<88x128xf32>
    %cst_13 = arith.constant 2.500000e-01 : f32
    %35 = vector.broadcast %cst_13 : f32 to vector<88x128xf32>
    %36 = arith.mulf %35, %20 : vector<88x128xf32>
    %cst_14 = arith.constant 1.000000e+00 : f32
    %37 = vector.broadcast %cst_14 : f32 to vector<88x128xf32>
    %38 = arith.subf %37, %20 : vector<88x128xf32>
    %cst_15 = arith.constant 7.500000e-01 : f32
    %39 = vector.broadcast %cst_15 : f32 to vector<88x128xf32>
    %40 = arith.mulf %39, %38 : vector<88x128xf32>
    %41 = arith.addf %36, %40 : vector<88x128xf32>
    %cst_16 = arith.constant 1.000000e+00 : f32
    %42 = vector.broadcast %cst_16 : f32 to vector<88x128xf32>
    %43 = arith.subf %42, %34 : vector<88x128xf32>
    %44 = arith.mulf %43, %43 : vector<88x128xf32>
    %45 = arith.mulf %41, %44 : vector<88x128xf32>
    %cst_17 = arith.constant 0.000000e+00 : f32
    %46 = vector.broadcast %cst_17 : f32 to vector<88x128xf32>
    %47 = arith.maximumf %0, %46 : vector<88x128xf32>
    %48 = arith.mulf %0, %20 : vector<88x128xf32>
    %49 = arith.subf %47, %48 : vector<88x128xf32>
    %50 = math.absf %0 : vector<88x128xf32>
    %cst_18 = arith.constant 0.000000e+00 : f32
    %51 = vector.broadcast %cst_18 : f32 to vector<88x128xf32>
    %52 = arith.subf %51, %50 : vector<88x128xf32>
    %53 = math.exp %52 : vector<88x128xf32>
    %cst_19 = arith.constant 1.000000e+00 : f32
    %54 = vector.broadcast %cst_19 : f32 to vector<88x128xf32>
    %55 = arith.addf %54, %53 : vector<88x128xf32>
    %56 = math.log %55 : vector<88x128xf32>
    %57 = arith.addf %49, %56 : vector<88x128xf32>
    %cst_20 = arith.constant -9.765625E-4 : f32
    %58 = vector.broadcast %cst_20 : f32 to vector<88x1xf32>
    %59 = arith.mulf %2, %58 : vector<88x1xf32>
    %60 = math.exp %59 : vector<88x1xf32>
    %cst_21 = arith.constant 2.000000e+00 : f32
    %61 = vector.broadcast %cst_21 : f32 to vector<88x1xf32>
    %62 = arith.mulf %61, %60 : vector<88x1xf32>
    %cst_22 = arith.constant 1.000000e+00 : f32
    %cst_23 = arith.constant 2.000000e+00 : f32
    %63 = vector.broadcast %cst_22 : f32 to vector<88x1xf32>
    %64 = arith.maximumf %63, %62 : vector<88x1xf32>
    %65 = vector.broadcast %cst_23 : f32 to vector<88x1xf32>
    %66 = arith.minimumf %65, %64 : vector<88x1xf32>
    %67 = arith.mulf %45, %57 : vector<88x128xf32>
    %68 = vector.broadcast %66 : vector<88x1xf32> to vector<88x128xf32>
    %69 = arith.mulf %67, %68 : vector<88x128xf32>
    %70 = arith.mulf %69, %15 : vector<88x128xf32>
    %cst_24 = arith.constant dense<0.000000e+00> : vector<128xf32>
    %71 = vector.multi_reduction <add>, %70, %cst_24 [0] : vector<88x128xf32> to vector<128xf32>
    %72 = vector.shape_cast %71 : vector<128xf32> to vector<1x128xf32>
    %73 = vector.shape_cast %72 : vector<1x128xf32> to vector<1x1x128xf32>
    %c0_25 = arith.constant 0 : index
    %c0_26 = arith.constant 0 : index
    %c0_27 = arith.constant 0 : index
    %74 = vector.load %arg5[%c0_25, %c0_26, %c0_27] : memref<1x1x128xf32, #tpu.memory_space<vmem>>, vector<1x1x128xf32>
    tpu.vector_store %arg5[%c0_25, %c0_26, %c0_27], %73 {strides = array<i32>} : memref<1x1x128xf32, #tpu.memory_space<vmem>>, vector<1x1x128xf32>,
    %75 = tpu.iota {dimensions = array<i32: 0>} : vector<88x1xi32>
    %76 = vector.broadcast %4 : i32 to vector<88x1xi32>
    %77 = arith.addi %75, %76 : vector<88x1xi32>
    %c83_i32_28 = arith.constant 83 : i32
    %78 = vector.broadcast %c83_i32_28 : i32 to vector<88x1xi32>
    %79 = arith.cmpi slt, %77, %78 : vector<88x1xi32>
    %80 = arith.extui %79 : vector<88x1xi1> to vector<88x1xi32>
    %81 = arith.sitofp %80 : vector<88x1xi32> to vector<88x1xf32>
    %cst_29 = arith.constant 0.000000e+00 : f32
    %82 = vector.broadcast %cst_29 : f32 to vector<88x1xf32>
    %83 = arith.subf %82, %3 : vector<88x1xf32>
    %cst_30 = arith.constant 0.000000e+00 : f32
    %84 = vector.broadcast %cst_30 : f32 to vector<88x1xf32>
    %85 = arith.maximumf %83, %84 : vector<88x1xf32>
    %86 = math.absf %3 : vector<88x1xf32>
    %cst_31 = arith.constant 0.000000e+00 : f32
    %87 = vector.broadcast %cst_31 : f32 to vector<88x1xf32>
    %88 = arith.subf %87, %86 : vector<88x1xf32>
    %89 = math.exp %88 : vector<88x1xf32>
    %cst_32 = arith.constant 1.000000e+00 : f32
    %90 = vector.broadcast %cst_32 : f32 to vector<88x1xf32>
    %91 = arith.addf %90, %89 : vector<88x1xf32>
    %92 = math.log %91 : vector<88x1xf32>
    %93 = arith.addf %85, %92 : vector<88x1xf32>
    %94 = arith.mulf %93, %81 : vector<88x1xf32>
    %cst_33 = arith.constant dense<0.000000e+00> : vector<1xf32>
    %95 = vector.multi_reduction <add>, %94, %cst_33 [0] : vector<88x1xf32> to vector<1xf32>
    %96 = vector.shape_cast %95 : vector<1xf32> to vector<1x1xf32>
    %97 = vector.shape_cast %96 : vector<1x1xf32> to vector<1x1x1xf32>
    %c0_34 = arith.constant 0 : index
    %c0_35 = arith.constant 0 : index
    %c0_36 = arith.constant 0 : index
    %98 = vector.load %arg6[%c0_34, %c0_35, %c0_36] : memref<1x1x1xf32, #tpu.memory_space<vmem>>, vector<1x1x1xf32>
    tpu.vector_store %arg6[%c0_34, %c0_35, %c0_36], %97 {strides = array<i32>} : memref<1x1x1xf32, #tpu.memory_space<vmem>>, vector<1x1x1xf32>,
    return
  }
  func.func @transform_0(%arg0: i32) -> (i32, i32) {
    %c0_i32 = arith.constant 0 : i32
    %c0_i32_0 = arith.constant 0 : i32
    return %arg0, %c0_i32 : i32, i32
  }
  func.func @transform_1(%arg0: i32) -> (i32, i32) {
    %c0_i32 = arith.constant 0 : i32
    %c0_i32_0 = arith.constant 0 : i32
    return %arg0, %c0_i32 : i32, i32
  }
  func.func @transform_2(%arg0: i32) -> (i32, i32) {
    %c0_i32 = arith.constant 0 : i32
    %c0_i32_0 = arith.constant 0 : i32
    return %arg0, %c0_i32 : i32, i32
  }
  func.func @transform_3(%arg0: i32) -> (i32, i32) {
    %c0_i32 = arith.constant 0 : i32
    %c0_i32_0 = arith.constant 0 : i32
    return %arg0, %c0_i32 : i32, i32
  }
  func.func @transform_4(%arg0: i32) -> (i32, i32, i32) {
    %c0_i32 = arith.constant 0 : i32
    %c0_i32_0 = arith.constant 0 : i32
    %c0_i32_1 = arith.constant 0 : i32
    return %arg0, %c0_i32, %c0_i32_0 : i32, i32, i32
  }
  func.func @transform_5(%arg0: i32) -> (i32, i32, i32) {
    %c0_i32 = arith.constant 0 : i32
    %c0_i32_0 = arith.constant 0 : i32
    %c0_i32_1 = arith.constant 0 : i32
    return %arg0, %c0_i32, %c0_i32_0 : i32, i32, i32
  }
}

</mosaic_0001>

<bundles_post_ra>
// kernel: size_aware_loss_wrapper.2
= control target key start
LH: loop header
LB: loop body
LE: loop exit
PB: predicated region body
PF: predicated region fallthrough
CT: control target
= control target key end

     0   :  { %v99_v29 = vmov 0.0   ;;  %v66_v37 = vlaneseq  ;;  %s137_s0 = inlined_call_operand.vmem [shape: f32[8,1,128], index: 0, kind: input, shape index: {}]   ;;  %s138_s1 = inlined_call_operand.vmem [shape: f32[1,1,128], index: 1, kind: output, shape index: {}]  }
   0x1   :  { %v8_v0 = vld [vmem:[%s137_s0] sm:$0x1]  ;;  %v85_v1 = vld [vmem:[%s137_s0 + $0x1] sm:$0x1]  ;;  %v86_v2 = vld [vmem:[%s137_s0 + $0x2] sm:$0x1] }
   0x2   :  { %v87_v3 = vld [vmem:[%s137_s0 + $0x3] sm:$0x1]  ;;  %v88_v4 = vld [vmem:[%s137_s0 + $0x4] sm:$0x1]  ;;  %v89_v5 = vld [vmem:[%s137_s0 + $0x5] sm:$0x1] }
   0x3   :  { %v90_v6 = vld [vmem:[%s137_s0 + $0x6] sm:$0x1]  ;;  %v91_v7 = vld [vmem:[%s137_s0 + $0x7] sm:$0x1]  ;;  %v23_v8 = vmul.f32 0.5, %v86_v2  ;;  %v26_v9 = vmul.f32 0.5, %v87_v3  ;;  %v39_v20 = vmul.f32 %v87_v3, %v86_v2 }
   0x4   :  { %v29_v10 = vmul.f32 0.5, %v90_v6  ;;  %v32_v11 = vmul.f32 0.5, %v91_v7  ;;  %v40_v21 = vmul.f32 %v91_v7, %v90_v6  ;;  %v67_v38 = vshrl.u32 %v66_v37, 7 }
   0x5   :  { %v24_v12 = vsub.f32 %v8_v0, %v23_v8  ;;  %v25_v13 = vadd.f32 %v23_v8, %v8_v0  ;;  %v27_v14 = vsub.f32 %v85_v1, %v26_v9  ;;  %v28_v15 = vadd.f32 %v85_v1, %v26_v9 }
   0x6   :  { %v30_v16 = vsub.f32 %v88_v4, %v29_v10  ;;  %v31_v17 = vadd.f32 %v88_v4, %v29_v10  ;;  %v33_v18 = vsub.f32 %v89_v5, %v32_v11  ;;  %v34_v19 = vadd.f32 %v89_v5, %v32_v11 }
   0x7   :  { %v60_v26 = vmul.f32 -0.0009765625, %v40_v21  ;;  %v50_v32 = vadd.f32 %v40_v21, %v39_v20  ;;  %v71_v43 = vand.u32 127, %v66_v37  ;;  %v72_v44 = vmul.u32 128, %v67_v38 }
   0x8   :  { %v35_v22 = vmax.f32 %v24_v12, %v30_v16  ;;  %v36_v23 = vmax.f32 %v27_v14, %v33_v18  ;;  %v37_v24 = vmin.f32 %v25_v13, %v31_v17  ;;  %v38_v25 = vmin.f32 %v28_v15, %v34_v19 }
   0x9   :  { %v61_v34 = vmul.f32 1.442695, %v60_v26  ;;  %v73_v48 = vadd.s32 %v72_v44, %v71_v43 }
   0xa   :  { %vm41_vm0 = vcmp.lt.f32.partialorder %v35_v22, %v37_v24  ;;  %vm42_vm1 = vcmp.lt.f32.partialorder %v36_v23, %v38_v25  ;;  %v46_v27 = vsub.f32 %v37_v24, %v35_v22  ;;  %v47_v28 = vsub.f32 %v38_v25, %v36_v23 }
   0xb   :  { %vm43_vm2 = vmand %vm41_vm0, %vm42_vm1  ;;  %95 = vpow2.f32 %v61_v34  ;;  %vm74_vm3 = vcmp.lt.s32.totalorder %v73_v48, 83 }
   0xc   :  { %v92_v30 = vsel %vm43_vm2, 1.0, %v99_v29  ;;  %v48_v31 = vmul.f32 %v47_v28, %v46_v27  ;;  %v93_v53 = vsel %vm74_vm3, 1.0, %v99_v29 }
   0xe   :  { %v49_v33 = vmul.f32 %v92_v30, %v48_v31 }
  0x10   :  { %v51_v35 = vsub.f32 %v50_v32, %v49_v33 }
  0x12   :  { %v52_v36 = vadd.f32 1e-16, %v51_v35 }
  0x14   :  { %97 = vrcp.f32 %v52_v36 }
  0x15   :  { %v96_v39 = vpop.eup %95 }
  0x16   :  { %v63_v42 = vmul.f32 2.0, %v96_v39 }
  0x18   :  { %v64_v47 = vmax.f32 %v63_v42, 1.0 }
  0x1a   :  { %v65_v51 = vmin.f32 %v64_v47, 2.0 }
  0x1e   :  { %v98_v40 = vpop.eup %97 }
  0x1f   :  { %v54_v41 = vmul.f32 %v98_v40, %v52_v36 }
  0x21   :  { %v55_v45 = vsub.f32 2.0, %v54_v41 }
  0x23   :  { %v56_v46 = vmul.f32 %v98_v40, %v55_v45 }
  0x25   :  { %v57_v49 = vmul.f32 %v56_v46, %v49_v33 }
  0x27   :  { %v58_v50 = vmul.f32 %v57_v49, %v57_v49 }
  0x29   :  { %v59_v52 = vsub.f32 1.0, %v58_v50 }
  0x2b   :  { %v77_v54 = vmul.f32 %v65_v51, %v59_v52 }
  0x2d   :  { %v78_v55 = vmul.f32 %v93_v53, %v77_v54 }
  0x2f   :  { %80 = vst [vmem:[%s138_s1] sm:$0x1] %v78_v55 }

// kernel: size_aware_loss_wrapper.3
= control target key start
LH: loop header
LB: loop body
LE: loop exit
PB: predicated region body
PF: predicated region fallthrough
CT: control target
= control target key end

     0   :  { %v1056_v2 = vmov 0   ;;  %s1688_s0 = inlined_call_operand.vmem [shape: f32[88,128], index: 0, kind: input, shape index: {}]   ;;  %s1689_s1 = inlined_call_operand.vmem [shape: s32[88,1], index: 1, kind: input, shape index: {}]   ;;  %s1690_s2 = inlined_call_operand.vmem [shape: f32[88,1], index: 2, kind: input, shape index: {}]   ;;  %s1691_s3 = inlined_call_operand.vmem [shape: f32[88,1], index: 3, kind: input, shape index: {}]   ;;  %s1692_s4 = inlined_call_operand.vmem [shape: f32[1,1,128], index: 4, kind: output, shape index: {0}]   ;;  %s1693_s5 = inlined_call_operand.hbm [shape: f32[1,1,1], index: 5, kind: output, shape index: {1}]  }
   0x1   :  { %v33_v0 = vld [vmem:[%s1689_s1 + $0x10] sm:$0xff]  ;;  %v31_v1 = vld [vmem:[%s1689_s1] sm:$0xff]  ;;  %877 = vset.pattern.permute.xlu1 %v1056_v2  ;;  %876 = vset.pattern.permute.xlu0 %v1056_v2  ;;  %v34_v3 = vld [vmem:[%s1689_s1 + $0x18] sm:$0xff] }
   0x2   :  { %143 = vperm.xlu1 %877, %v33_v0   ;;  %137 = vperm.xlu0 %876, %v31_v1   ;;  %v32_v4 = vld [vmem:[%s1689_s1 + $0x8] sm:$0xff]  ;;  %v42_v6 = vld [vmem:[%s1690_s2] sm:$0xff]  ;;  %v44_v9 = vld [vmem:[%s1690_s2 + $0x10] sm:$0xff] }
   0x3   :  { %v43_v5 = vld [vmem:[%s1690_s2 + $0x8] sm:$0xff]  ;;  %v499_v8 = vmul.f32 -0.0009765625, %v42_v6  ;;  %v46_v10 = vld [vmem:[%s1690_s2 + $0x20] sm:$0xff]  ;;  %v501_v13 = vmul.f32 -0.0009765625, %v44_v9  ;;  %v45_v15 = vld [vmem:[%s1690_s2 + $0x18] sm:$0xff] }
   0x4   :  { %v500_v7 = vmul.f32 -0.0009765625, %v43_v5  ;;  %v36_v11 = vld [vmem:[%s1689_s1 + $0x28] sm:$0xff]  ;;  %v35_v12 = vld [vmem:[%s1689_s1 + $0x20] sm:$0xff]  ;;  %v503_v14 = vmul.f32 -0.0009765625, %v46_v10  ;;  %v48_v16 = vld [vmem:[%s1690_s2 + $0x30] sm:$0xff]  ;;  %v502_v20 = vmul.f32 -0.0009765625, %v45_v15 }
   0x5   :  { %v47_v17 = vld [vmem:[%s1690_s2 + $0x28] sm:$0xff]  ;;  %v510_v19 = vmul.f32 1.442695, %v499_v8  ;;  %v505_v21 = vmul.f32 -0.0009765625, %v48_v16  ;;  %v514_v22 = vmul.f32 1.442695, %v501_v13 }
   0x6   :  { %146 = vperm.xlu1 %877, %v34_v3   ;;  %140 = vperm.xlu0 %876, %v32_v4   ;;  %v512_v18 = vmul.f32 1.442695, %v500_v7  ;;  %v518_v23 = vmul.f32 1.442695, %v503_v14  ;;  %v504_v24 = vmul.f32 -0.0009765625, %v47_v17  ;;  %v50_v25 = vld [vmem:[%s1690_s2 + $0x40] sm:$0xff] }
   0x7   :  { %v516_v26 = vmul.f32 1.442695, %v502_v20  ;;  %v507_v27 = vmul.f32 -0.0009765625, %v50_v25  ;;  %v49_v28 = vld [vmem:[%s1690_s2 + $0x38] sm:$0xff]  ;;  %v522_v29 = vmul.f32 1.442695, %v505_v21 }
   0x8   :  { %878 = vpow2.f32 %v512_v18  ;;  %v506_v30 = vmul.f32 -0.0009765625, %v49_v28  ;;  %v52_v31 = vld [vmem:[%s1690_s2 + $0x50] sm:$0xff]  ;;  %v520_v32 = vmul.f32 1.442695, %v504_v24  ;;  %v51_v33 = vld [vmem:[%s1690_s2 + $0x48] sm:$0xff]  ;;  %v38_v34 = vld [vmem:[%s1689_s1 + $0x38] sm:$0xff] }
   0x9   :  { %880 = vpow2.f32 %v510_v19  ;;  %v37_v35 = vld [vmem:[%s1689_s1 + $0x30] sm:$0xff]  ;;  %v526_v36 = vmul.f32 1.442695, %v507_v27  ;;  %v509_v37 = vmul.f32 -0.0009765625, %v52_v31  ;;  %v508_v39 = vmul.f32 -0.0009765625, %v51_v33  ;;  %v40_v40 = vld [vmem:[%s1689_s1 + $0x48] sm:$0xff] }
   0xa   :  { %152 = vperm.xlu1 %877, %v36_v11   ;;  %149 = vperm.xlu0 %876, %v35_v12   ;;  %882 = vpow2.f32 %v514_v22  ;;  %v524_v38 = vmul.f32 1.442695, %v506_v30  ;;  %v39_v41 = vld [vmem:[%s1689_s1 + $0x40] sm:$0xff] }
   0xb   :  { %884 = vpow2.f32 %v518_v23  ;;  %v530_v42 = vmul.f32 1.442695, %v509_v37  ;;  %v528_v43 = vmul.f32 1.442695, %v508_v39 }
   0xc   :  { %886 = vpow2.f32 %v516_v26 }
   0xd   :  { %888 = vpow2.f32 %v522_v29 }
   0xe   :  { %158 = vperm.xlu1 %877, %v38_v34   ;;  %155 = vperm.xlu0 %876, %v37_v35   ;;  %890 = vpow2.f32 %v520_v32 }
   0xf   :  { %892 = vpow2.f32 %v526_v36 }
  0x10   :  { %894 = vpow2.f32 %v524_v38 }
  0x11   :  { %896 = vpow2.f32 %v530_v42 }
  0x12   :  { %v879_v44 = vpop.eup %878  ;;  %164 = vperm.xlu1 %877, %v40_v40   ;;  %161 = vperm.xlu0 %876, %v39_v41  }
  0x13   :  { %v881_v45 = vpop.eup %880  ;;  %v533_v46 = vmul.f32 2.0, %v879_v44 }
  0x14   :  { %v883_v47 = vpop.eup %882  ;;  %v532_v48 = vmul.f32 2.0, %v881_v45 }
  0x15   :  { %11 = vsyncpa [#allocation3], 0  ;;  %v885_v49 = vpop.eup %884  ;;  %v544_v50 = vmax.f32 %v533_v46, 1.0  ;;  %v534_v51 = vmul.f32 2.0, %v883_v47  ;;  %898 = vpow2.f32 %v528_v43  ;;  %v1155_v61 = vld [vmem:[%s1688_s0 + $0x10] sm:$0xff]  ;;  %v1160_v1 = vld [vmem:[%s1688_s0] sm:$0xff] }
  0x16   :  { %v887_v52 = vpop.eup %886  ;;  %v543_v53 = vmax.f32 %v532_v48, 1.0  ;;  %v536_v54 = vmul.f32 2.0, %v885_v49  ;;  %v1165_v2 = vld [vmem:[%s1688_s0 + $0x18] sm:$0xff]  ;;  %v41_v7 = vld [vmem:[%s1689_s1 + $0x50] sm:$0xff]  ;;  %v193_v8 = vsub.f32 0.0, %v1155_v61  ;;  %v191_v9 = vsub.f32 0.0, %v1160_v1 }
  0x17   :  { %v889_v55 = vpop.eup %888  ;;  %v555_v56 = vmin.f32 %v544_v50, 2.0  ;;  %v545_v57 = vmax.f32 %v534_v51, 1.0  ;;  %v535_v58 = vmul.f32 2.0, %v887_v52  ;;  %v194_v10 = vsub.f32 0.0, %v1165_v2  ;;  %v1176_v11 = vld [vmem:[%s1688_s0 + $0x8] sm:$0xff]  ;;  %v1186_v20 = vld [vmem:[%s1688_s0 + $0x20] sm:$0xff] }
  0x18   :  { %v891_v59 = vpop.eup %890  ;;  %v554_v60 = vmin.f32 %v543_v53, 2.0  ;;  %v547_v63 = vmax.f32 %v536_v54, 1.0  ;;  %v538_v0 = vmul.f32 2.0, %v889_v55  ;;  %v1181_v15 = vld [vmem:[%s1688_s0 + $0x28] sm:$0xff]  ;;  %v206_v22 = vmul.f32 1.442695, %v193_v8 }
  0x19   :  { %583 = vperm.xlu1 %877, %v555_v56   ;;  %v556_v62 = vmin.f32 %v545_v57, 2.0  ;;  %v893_v3 = vpop.eup %892  ;;  %v546_v4 = vmax.f32 %v535_v58, 1.0  ;;  %v537_v5 = vmul.f32 2.0, %v891_v59  ;;  %1704 = vst [vmem:[#allocation5_spill] sm:$0xff] %v1181_v15  ;;  %v192_v23 = vsub.f32 0.0, %v1176_v11  ;;  %v1192_v24 = vld [vmem:[%s1688_s0 + $0x38] sm:$0xff] }
  0x1a   :  { %578 = vperm.xlu0 %876, %v554_v60   ;;  %v895_v6 = vpop.eup %894  ;;  %v558_v12 = vmin.f32 %v547_v63, 2.0  ;;  %v549_v13 = vmax.f32 %v538_v0, 1.0  ;;  %v540_v14 = vmul.f32 2.0, %v893_v3  ;;  %1705 = vst [vmem:[#allocation6_spill] sm:$0xff] %v1192_v24  ;;  %v202_v25 = vmul.f32 1.442695, %v191_v9 }
  0x1b   :  { %v897_v16 = vpop.eup %896  ;;  %v557_v17 = vmin.f32 %v546_v4, 2.0  ;;  %v548_v18 = vmax.f32 %v537_v5, 1.0  ;;  %v539_v19 = vmul.f32 2.0, %v895_v6  ;;  %v208_v26 = vmul.f32 1.442695, %v194_v10  ;;  %v1198_v28 = vld [vmem:[%s1688_s0 + $0x30] sm:$0xff] }
  0x1c   :  { %v196_v27 = vsub.f32 0.0, %v1181_v15  ;;  %v560_v29 = vmin.f32 %v549_v13, 2.0  ;;  %v551_v30 = vmax.f32 %v540_v14, 1.0  ;;  %v542_v31 = vmul.f32 2.0, %v897_v16  ;;  %v1204_v33 = vld [vmem:[%s1688_s0 + $0x48] sm:$0xff]  ;;  %v1213_v63 = vld [vmem:[%s1688_s0 + $0x40] sm:$0xff] }
  0x1d   :  { %588 = vperm.xlu1 %877, %v556_v62   ;;  %v195_v32 = vsub.f32 0.0, %v1186_v20  ;;  %1706 = vst [vmem:[#allocation7_spill] sm:$0xff] %v1204_v33  ;;  %v559_v34 = vmin.f32 %v548_v18, 2.0  ;;  %v550_v35 = vmax.f32 %v539_v19, 1.0  ;;  %v198_v37 = vsub.f32 0.0, %v1192_v24  ;;  %v1222_v16 = vld [vmem:[%s1688_s0 + $0x50] sm:$0xff] }
  0x1e   :  { %167 = vperm.xlu0 %876, %v41_v7   ;;  %v204_v38 = vmul.f32 1.442695, %v192_v23  ;;  %v197_v39 = vsub.f32 0.0, %v1198_v28  ;;  %900 = vpow2.f32 %v206_v22  ;;  %v212_v40 = vmul.f32 1.442695, %v196_v27  ;;  %1707 = vst [vmem:[#allocation8_spill] sm:$0xff] %v1222_v16 }
  0x1f   :  { %v899_v21 = vpop.eup %898  ;;  %v200_v41 = vsub.f32 0.0, %v1204_v33  ;;  %v562_v42 = vmin.f32 %v551_v30, 2.0  ;;  %v553_v43 = vmax.f32 %v542_v31, 1.0  ;;  %902 = vpow2.f32 %v202_v25 }
  0x20   :  { %v541_v36 = vmul.f32 2.0, %v899_v21  ;;  %v210_v44 = vmul.f32 1.442695, %v195_v32  ;;  %v561_v45 = vmin.f32 %v550_v35, 2.0  ;;  %904 = vpow2.f32 %v208_v26 }
  0x21   :  { %598 = vperm.xlu1 %877, %v558_v12   ;;  %v216_v47 = vmul.f32 1.442695, %v198_v37  ;;  %906 = vpow2.f32 %v204_v38  ;;  %v214_v48 = vmul.f32 1.442695, %v197_v39  ;;  %v220_v49 = vmul.f32 1.442695, %v200_v41 }
  0x22   :  { %593 = vperm.xlu0 %876, %v557_v17   ;;  %v552_v46 = vmax.f32 %v541_v36, 1.0  ;;  %908 = vpow2.f32 %v212_v40  ;;  %v564_v50 = vmin.f32 %v553_v43, 2.0  ;;  %v412_v62 = vand.u32 2147483647, %v1176_v11  ;;  %v1239_v41 = vld [vmem:[%s1691_s3] sm:$0xff] }
  0x23   :  { %910 = vpow2.f32 %v210_v44  ;;  %v411_v3 = vand.u32 2147483647, %v1160_v1  ;;  %v413_v6 = vand.u32 2147483647, %v1155_v61  ;;  %v199_v10 = vsub.f32 0.0, %v1213_v63 }
  0x24   :  { %v563_v51 = vmin.f32 %v552_v46, 2.0  ;;  %912 = vpow2.f32 %v216_v47  ;;  %v415_v12 = vand.u32 2147483647, %v1186_v20  ;;  %v423_v14 = vsub.f32 0.0, %v412_v62  ;;  %v1251_v46 = vld [vmem:[%s1691_s3 + $0x10] sm:$0xff]  ;;  %v1256_v47 = vld [vmem:[%s1691_s3 + $0x18] sm:$0xff] }
  0x25   :  { %608 = vperm.xlu1 %877, %v560_v29   ;;  %914 = vpow2.f32 %v214_v48  ;;  %v414_v17 = vand.u32 2147483647, %v1165_v2  ;;  %v422_v19 = vsub.f32 0.0, %v411_v3  ;;  %v417_v21 = vand.u32 2147483647, %v1198_v28  ;;  %v1231_v29 = vld [vmem:[%s1691_s3 + $0x50] sm:$0xff] }
  0x26   :  { %603 = vperm.xlu0 %876, %v559_v34   ;;  %916 = vpow2.f32 %v220_v49  ;;  %v424_v23 = vsub.f32 0.0, %v413_v6  ;;  %v416_v25 = vand.u32 2147483647, %v1181_v15  ;;  %v218_v26 = vmul.f32 1.442695, %v199_v10  ;;  %v1293_v6 = vld [vmem:[%s1691_s3 + $0x40] sm:$0xff] }
  0x27   :  { %v201_v27 = vsub.f32 0.0, %v1222_v16  ;;  %v418_v30 = vand.u32 2147483647, %v1192_v24  ;;  %v435_v31 = vmul.f32 1.442695, %v423_v14  ;;  %v426_v32 = vsub.f32 0.0, %v415_v12 }
  0x28   :  { %v901_v52 = vpop.eup %900  ;;  %v419_v34 = vand.u32 2147483647, %v1213_v63  ;;  %v433_v35 = vmul.f32 1.442695, %v422_v19  ;;  %v425_v36 = vsub.f32 0.0, %v414_v17  ;;  %v428_v38 = vsub.f32 0.0, %v417_v21 }
  0x29   :  { %618 = vperm.xlu1 %877, %v562_v42   ;;  %v903_v53 = vpop.eup %902  ;;  %v226_v56 = vadd.f32 1.0, %v901_v52  ;;  %v437_v37 = vmul.f32 1.442695, %v424_v23  ;;  %v724_v39 = vand.u32 2147483647, %v1231_v29  ;;  %v427_v44 = vsub.f32 0.0, %v416_v25 }
  0x2a   :  { %613 = vperm.xlu0 %876, %v561_v45   ;;  %v905_v54 = vpop.eup %904  ;;  %v224_v58 = vadd.f32 1.0, %v903_v53  ;;  %v222_v40 = vmul.f32 1.442695, %v201_v27  ;;  %v441_v43 = vmul.f32 1.442695, %v426_v32  ;;  %v1246_v45 = vld [vmem:[%s1691_s3 + $0x8] sm:$0xff] }
  0x2b   :  { %v907_v55 = vpop.eup %906  ;;  %v227_v60 = vadd.f32 1.0, %v905_v54  ;;  %918 = vrcp.f32 %v226_v56  ;;  %v439_v49 = vmul.f32 1.442695, %v425_v36  ;;  %v1263_v52 = vld [vmem:[%s1691_s3 + $0x20] sm:$0xff]  ;;  %v1268_v53 = vld [vmem:[%s1691_s3 + $0x28] sm:$0xff]  ;;  %v735_v56 = vsub.f32 0.0, %v724_v39 }
  0x2c   :  { %v909_v57 = vpop.eup %908  ;;  %v225_v4 = vadd.f32 1.0, %v907_v55  ;;  %920 = vrcp.f32 %v224_v58  ;;  %v445_v55 = vmul.f32 1.442695, %v428_v38  ;;  %v714_v58 = vand.u32 2147483647, %v1239_v41  ;;  %v1304_v17 = vld [vmem:[%s1691_s3 + $0x48] sm:$0xff] }
  0x2d   :  { %628 = vperm.xlu1 %877, %v564_v50   ;;  %v911_v59 = vpop.eup %910  ;;  %v229_v7 = vadd.f32 1.0, %v909_v57  ;;  %922 = vrcp.f32 %v227_v60  ;;  %v430_v50 = vsub.f32 0.0, %v419_v34  ;;  %v1275_v57 = vld [vmem:[%s1691_s3 + $0x30] sm:$0xff]  ;;  %v715_v60 = vand.u32 2147483647, %v1246_v45 }
  0x2e   :  { %623 = vperm.xlu0 %876, %v563_v51   ;;  %v913_v0 = vpop.eup %912  ;;  %v228_v9 = vadd.f32 1.0, %v911_v59  ;;  %924 = vrcp.f32 %v225_v4  ;;  %v429_v51 = vsub.f32 0.0, %v418_v30  ;;  %v716_v62 = vand.u32 2147483647, %v1251_v46 }
  0x2f   :  { %v915_v5 = vpop.eup %914  ;;  %v231_v13 = vadd.f32 1.0, %v913_v0  ;;  %926 = vrcp.f32 %v229_v7  ;;  %v717_v0 = vand.u32 2147483647, %v1256_v47  ;;  %v443_v4 = vmul.f32 1.442695, %v427_v44 }
  0x30   :  { %v917_v8 = vpop.eup %916  ;;  %v230_v18 = vadd.f32 1.0, %v915_v5  ;;  %928 = vrcp.f32 %v228_v9  ;;  %v1288_v5 = vld [vmem:[%s1691_s3 + $0x38] sm:$0xff]  ;;  %v718_v7 = vand.u32 2147483647, %v1263_v52  ;;  %v421_v9 = vand.u32 2147483647, %v1222_v16 }
  0x31   :  { %v233_v22 = vadd.f32 1.0, %v917_v8  ;;  %930 = vrcp.f32 %v231_v13  ;;  %v449_v10 = vmul.f32 1.442695, %v430_v50  ;;  %v447_v12 = vmul.f32 1.442695, %v429_v51  ;;  %s1058_s3 = smov [#allocation2]  }
  0x32   :  { %932 = vrcp.f32 %v230_v18  ;;  %v756_v14 = vmul.f32 1.442695, %v735_v56  ;;  %v719_v18 = vand.u32 2147483647, %v1268_v53  ;;  %v725_v19 = vsub.f32 0.0, %v714_v58  ;;  %s851_s26 = sshll.u32 %s1058_s3, 4  ;;  %s852_s26 = int_to_ptr.vmem [resolvable:$true] %s851_s26 }
  0x33   :  { %934 = vrcp.f32 %v233_v22  ;;  %v720_v22 = vand.u32 2147483647, %v1275_v57  ;;  %v726_v23 = vsub.f32 0.0, %v715_v60  ;;  %v727_v25 = vsub.f32 0.0, %v716_v62  ;;  %s1032_s27 = scalar_lea.vmem %s852_s26, 16  ;;  %s1036_s28 = scalar_lea.vmem %s852_s26, 32 }
  0x34   :  { %936 = vpow2.f32 %v218_v26  ;;  %v728_v26 = vsub.f32 0.0, %v717_v0  ;;  %v721_v30 = vand.u32 2147483647, %v1288_v5  ;;  %v432_v34 = vsub.f32 0.0, %v421_v9  ;;  %p1033_p0 = scmp.ne.s32.totalorder %s852_s26, %s1032_s27  ;;  %p1037_p1 = scmp.lt.s32.totalorder %s852_s26, %s852_s26 }
  0x35   :  { %v1241_v42 = vpop.eup %918  ;;  %938 = vpow2.f32 %v435_v31  ;;  %v729_v31 = vsub.f32 0.0, %v718_v7  ;;  %v723_v36 = vand.u32 2147483647, %v1304_v17  ;;  %v730_v38 = vsub.f32 0.0, %v719_v18  ;;  %p1038_p2 = scmp.lt.s32.totalorder %s1036_s28, %s1032_s27 }
  0x36   :  { %v1258_v48 = vpop.eup %920  ;;  %940 = vpow2.f32 %v433_v35  ;;  %v722_v35 = vand.u32 2147483647, %v1293_v6  ;;  %v736_v39 = vmul.f32 1.442695, %v725_v19  ;;  %v731_v44 = vsub.f32 0.0, %v720_v22 }
  0x37   :  { %v1270_v54 = vpop.eup %922  ;;  %942 = vpow2.f32 %v437_v37  ;;  %v742_v50 = vmul.f32 1.442695, %v728_v26  ;;  %v744_v56 = vmul.f32 1.442695, %v729_v31  ;;  %v453_v60 = vmul.f32 1.442695, %v432_v34  ;;  %p1039_p3 = por %p1038_p2, %p1037_p1 }
  0x38   :  { %v1278_v59 = vpop.eup %924  ;;  %944 = vpow2.f32 %v222_v40  ;;  %v738_v40 = vmul.f32 1.442695, %v726_v23  ;;  %v733_v62 = vsub.f32 0.0, %v722_v35  ;;  %v746_v7 = vmul.f32 1.442695, %v730_v38 }
  0x39   :  { %v1283_v3 = vpop.eup %926  ;;  %946 = vpow2.f32 %v441_v43  ;;  %vm813_vm0 = vcmask 7168   ;;  %vm841_vm14 = vcmask 0   ;;  %p1040_p4 = pnand %p1039_p3, %p1033_p0 }
  0x3a   :  { %v1296_v8 = vpop.eup %928  ;;  %948 = vpow2.f32 %v439_v49  ;;  %v740_v49 = vmul.f32 1.442695, %v727_v25  ;;  %v752_v18 = vmul.f32 1.442695, %v733_v62 }
  0x3b   :  { %v1299_v13 = vpop.eup %930  ;;  %950 = vpow2.f32 %v445_v55  ;;  %v732_v55 = vsub.f32 0.0, %v721_v30 }
  0x3c   :  { %v1307_v21 = vpop.eup %932  ;;  %952 = vpow2.f32 %v443_v4  ;;  %v734_v4 = vsub.f32 0.0, %v723_v36 }
  0x3d   :  { %v1310_v27 = vpop.eup %934  ;;  %954 = vpow2.f32 %v449_v10  ;;  %v748_v10 = vmul.f32 1.442695, %v731_v44 }
  0x3e   :  { %v937_v32 = vpop.eup %936  ;;  %956 = vpow2.f32 %v447_v12  ;;  %v754_v22 = vmul.f32 1.442695, %v734_v4 }
  0x3f   :  { %v939_v37 = vpop.eup %938  ;;  %958 = vpow2.f32 %v756_v14  ;;  %v750_v14 = vmul.f32 1.442695, %v732_v55  ;;  %v232_v25 = vadd.f32 1.0, %v937_v32 }
  0x40   :  { %v1315_v43 = vpop.eup %940  ;;  %960 = vpow2.f32 %v736_v39  ;;  %v456_v30 = vadd.f32 1.0, %v939_v37  ;;  %v420_v39 = vand.u32 2147483647, %v1204_v33 }
  0x41   :  { %v1317_v51 = vpop.eup %942  ;;  %962 = vpow2.f32 %v738_v40 }
  0x42   :  { %v1319_v58 = vpop.eup %944  ;;  %964 = vpow2.f32 %v740_v49  ;;  %v431_v62 = vsub.f32 0.0, %v420_v39 }
  0x43   :  { %v1321_v0 = vpop.eup %946  ;;  %966 = vpow2.f32 %v742_v50 }
  0x44   :  { %v1323_v9 = vpop.eup %948  ;;  %968 = vpow2.f32 %v744_v56  ;;  %v451_v39 = vmul.f32 1.442695, %v431_v62 }
  0x45   :  { %v1325_v12 = vpop.eup %950  ;;  %970 = vpow2.f32 %v453_v60 }
  0x46   :  { %v1327_v19 = vpop.eup %952  ;;  %972 = vpow2.f32 %v746_v7  ;;  %v65_v7 = vlaneseq }
  0x47   :  { %v1329_v23 = vpop.eup %954  ;;  %974 = vpow2.f32 %v748_v10  ;;  %v692_v10 = vsub.f32 0.0, %v1239_v41 }
  0x48   :  { %v1331_v26 = vpop.eup %956  ;;  %976 = vpow2.f32 %v750_v14 }
  0x49   :  { %v959_v31 = vpop.eup %958  ;;  %978 = vpow2.f32 %v752_v18 }
  0x4a   :  { %v961_v34 = vpop.eup %960  ;;  %980 = vpow2.f32 %v754_v22  ;;  %v768_v50 = vadd.f32 1.0, %v959_v31  ;;  %v693_v22 = vsub.f32 0.0, %v1246_v45  ;;  %v694_v31 = vsub.f32 0.0, %v1251_v46 }
  0x4b   :  { %v963_v35 = vpop.eup %962  ;;  %982 = vrcp.f32 %v232_v25  ;;  %v758_v36 = vadd.f32 1.0, %v961_v34  ;;  %v695_v34 = vsub.f32 0.0, %v1256_v47  ;;  %v696_v45 = vsub.f32 0.0, %v1263_v52 }
  0x4c   :  { %v965_v38 = vpop.eup %964  ;;  %984 = vlog2.f32 %v456_v30  ;;  %v759_v40 = vadd.f32 1.0, %v963_v35  ;;  %v66_v46 = vshrl.u32 %v65_v7, 7  ;;  %v697_v47 = vsub.f32 0.0, %v1268_v53 }
  0x4d   :  { %v967_v44 = vpop.eup %966  ;;  %v760_v49 = vadd.f32 1.0, %v965_v38  ;;  %986 = vlog2.f32 %v758_v36  ;;  %v455_v38 = vadd.f32 1.0, %v1315_v43  ;;  %v702_v52 = vsub.f32 0.0, %v1231_v29 }
  0x4e   :  { %v969_v32 = vpop.eup %968  ;;  %v761_v55 = vadd.f32 1.0, %v967_v44  ;;  %988 = vlog2.f32 %v759_v40  ;;  %v457_v44 = vadd.f32 1.0, %v1317_v51  ;;  %v234_v51 = vadd.f32 1.0, %v1319_v58 }
  0x4f   :  { %v1334_v37 = vpop.eup %970  ;;  %v762_v56 = vadd.f32 1.0, %v969_v32  ;;  %990 = vlog2.f32 %v760_v49  ;;  %v700_v58 = vsub.f32 0.0, %v1293_v6 }
  0x50   :  { %v973_v60 = vpop.eup %972  ;;  %992 = vlog2.f32 %v761_v55  ;;  %v704_v55 = vmax.f32 %v693_v22, 0.0  ;;  %v708_v22 = vmax.f32 %v697_v47, 0.0 }
  0x51   :  { %v975_v4 = vpop.eup %974  ;;  %v763_v14 = vadd.f32 1.0, %v973_v60  ;;  %994 = vlog2.f32 %v762_v56  ;;  %v705_v56 = vmax.f32 %v694_v31, 0.0  ;;  %v706_v60 = vmax.f32 %v695_v34, 0.0 }
  0x52   :  { %v977_v18 = vpop.eup %976  ;;  %996 = vlog2.f32 %v768_v50  ;;  %v764_v25 = vadd.f32 1.0, %v975_v4  ;;  %v703_v50 = vmax.f32 %v692_v10, 0.0 }
  0x53   :  { %v979_v30 = vpop.eup %978  ;;  %v765_v35 = vadd.f32 1.0, %v977_v18  ;;  %998 = vlog2.f32 %v763_v14  ;;  %v698_v18 = vsub.f32 0.0, %v1275_v57 }
  0x54   :  { %v981_v36 = vpop.eup %980  ;;  %v766_v41 = vadd.f32 1.0, %v979_v30  ;;  %1000 = vlog2.f32 %v764_v25  ;;  %v707_v25 = vmax.f32 %v696_v45, 0.0  ;;  %v1352_v30 = vadd.s32 80, %v66_v46 }
  0x55   :  { %v1341_v40 = vpop.eup %982  ;;  %v767_v49 = vadd.f32 1.0, %v981_v36  ;;  %1002 = vlog2.f32 %v765_v35  ;;  %v699_v36 = vsub.f32 0.0, %v1288_v5  ;;  %v709_v46 = vmax.f32 %v698_v18, 0.0 }
  0x56   :  { %v1345_v32 = vpop.eup %984  ;;  %1004 = vlog2.f32 %v766_v41  ;;  %1708 = vst [vmem:[#allocation9_spill] sm:$0xff] %v1352_v30  ;;  %vm101_vm1 = vcmp.lt.s32.totalorder %v1352_v30, 83 }
  0x57   :  { %v987_v43 = vpop.eup %986  ;;  %1006 = vlog2.f32 %v767_v49 }
  0x58   :  { %v989_v62 = vpop.eup %988  ;;  %1008 = vlog2.f32 %v455_v38  ;;  %v770_v4 = vmul.f32 0.6931472, %v987_v43  ;;  %v713_v43 = vmax.f32 %v702_v52, 0.0 }
  0x59   :  { %v991_v14 = vpop.eup %990  ;;  %1010 = vlog2.f32 %v457_v44  ;;  %v772_v53 = vmul.f32 0.6931472, %v989_v62 }
  0x5a   :  { %v993_v10 = vpop.eup %992  ;;  %v774_v31 = vmul.f32 0.6931472, %v991_v14  ;;  %v791_v34 = vadd.f32 %v770_v4, %v703_v50  ;;  %1012 = vpow2.f32 %v451_v39  ;;  %v710_v39 = vmax.f32 %v699_v36, 0.0 }
  0x5b   :  { %v995_v35 = vpop.eup %994  ;;  %v776_v38 = vmul.f32 0.6931472, %v993_v10  ;;  %v792_v29 = vadd.f32 %v772_v53, %v704_v55  ;;  %v701_v55 = vsub.f32 0.0, %v1304_v17  ;;  %v458_v17 = vadd.f32 1.0, %v1323_v9 }
  0x5c   :  { %v997_v41 = vpop.eup %996  ;;  %v778_v44 = vmul.f32 0.6931472, %v995_v35  ;;  %v793_v49 = vadd.f32 %v774_v31, %v705_v56  ;;  %v814_v57 = vsel %vm813_vm0, %v791_v34, 0.0  ;;  %v711_v34 = vmax.f32 %v700_v58, 0.0 }
  0x5d   :  { %v999_v45 = vpop.eup %998  ;;  %v794_v62 = vadd.f32 %v776_v38, %v706_v60  ;;  %v815_v47 = vsel %vm813_vm0, %v792_v29, 0.0  ;;  %v790_v38 = vmul.f32 0.6931472, %v997_v41  ;;  %v712_v58 = vmax.f32 %v701_v55, 0.0 }
  0x5e   :  { %v1001_v50 = vpop.eup %1000  ;;  %v780_v4 = vmul.f32 0.6931472, %v999_v45  ;;  %v795_v14 = vadd.f32 %v778_v44, %v707_v25  ;;  %v816_v5 = vadd.f32 %v815_v47, %v814_v57  ;;  %v817_v6 = vsel %vm813_vm0, %v793_v49, 0.0 }
  0x5f   :  { %v1003_v10 = vpop.eup %1002  ;;  %v782_v53 = vmul.f32 0.6931472, %v1001_v50  ;;  %v819_v56 = vsel %vm813_vm0, %v794_v62, 0.0  ;;  %v459_v49 = vadd.f32 1.0, %v1321_v0  ;;  %1014 = vrcp.f32 %v234_v51 }
  0x60   :  { %v1005_v31 = vpop.eup %1004  ;;  %v784_v52 = vmul.f32 0.6931472, %v1003_v10  ;;  %v796_v18 = vadd.f32 %v780_v4, %v708_v22  ;;  %v818_v60 = vadd.f32 %v817_v6, %v816_v5  ;;  %v821_v25 = vsel %vm813_vm0, %v795_v14, 0.0 }
  0x61   :  { %v1007_v35 = vpop.eup %1006  ;;  %v786_v29 = vmul.f32 0.6931472, %v1005_v31  ;;  %v797_v45 = vadd.f32 %v782_v53, %v709_v46  ;;  %v461_v46 = vadd.f32 1.0, %v1325_v12  ;;  %v460_v50 = vadd.f32 1.0, %v1327_v19 }
  0x62   :  { %v1362_v44 = vpop.eup %1008  ;;  %v820_v36 = vadd.f32 %v819_v56, %v818_v60  ;;  %v788_v22 = vmul.f32 0.6931472, %v1007_v35  ;;  %v798_v62 = vadd.f32 %v784_v52, %v710_v39  ;;  %v823_v41 = vsel %vm813_vm0, %v796_v18, 0.0 }
  0x63   :  { %v1367_v57 = vpop.eup %1010  ;;  %v801_v4 = vadd.f32 %v790_v38, %v713_v43  ;;  %v799_v0 = vadd.f32 %v786_v29, %v711_v34  ;;  %v825_v9 = vsel %vm813_vm0, %v797_v45, 0.0  ;;  %1016 = vlog2.f32 %v459_v49 }
  0x64   :  { %v822_v47 = vadd.f32 %v821_v25, %v820_v36  ;;  %v1013_v14 = vpop.eup %1012  ;;  %v463_v5 = vadd.f32 1.0, %v1329_v23  ;;  %v1696_v6 = vmov 0.0   ;;  %1018 = vlog2.f32 %v458_v17 }
  0x65   :  { %v872_v10 = vsel %vm101_vm1, 1.0, %v1696_v6  ;;  %v462_v12 = vadd.f32 1.0, %v1331_v26  ;;  %v800_v51 = vadd.f32 %v788_v22, %v712_v58  ;;  %v827_v19 = vsel %vm813_vm0, %v798_v62, 0.0 }
  0x66   :  { %v824_v55 = vadd.f32 %v823_v41, %v822_v47  ;;  %1020 = vlog2.f32 %v461_v46  ;;  %v465_v43 = vadd.f32 1.0, %v1334_v37  ;;  %v812_v53 = vmul.f32 %v872_v10, %v801_v4 }
  0x67   :  { %1022 = vlog2.f32 %v460_v50  ;;  %v464_v56 = vadd.f32 1.0, %v1013_v14  ;;  %v829_v23 = vsel %vm813_vm0, %v799_v0, 0.0  ;;  %v1382_v31 = vand.u32 127, %v65_v7 }
  0x68   :  { %v826_v39 = vadd.f32 %v825_v9, %v824_v55  ;;  %1024 = vlog2.f32 %v463_v5  ;;  %v831_v26 = vsel %vm813_vm0, %v800_v51, 0.0  ;;  %v833_v37 = vsel %vm813_vm0, %v812_v53, 0.0 }
  0x69   :  { %1026 = vlog2.f32 %v462_v12  ;;  %vm102_vm2 = vcmp.lt.s32.totalorder %v1382_v31, 7  ;;  %v1387_v18 = vpop.eup %1014  ;;  %v270_v36 = vsub.f32 1.0, %v1241_v42  ;;  %v268_v46 = vsub.f32 1.0, %v1258_v48 }
  0x6a   :  { %v828_v34 = vadd.f32 %v827_v19, %v826_v39  ;;  %1028 = vlog2.f32 %v465_v43  ;;  %v1392_v7 = vsel %vm102_vm2, 1.0, %v1696_v6  ;;  %v271_v9 = vsub.f32 1.0, %v1270_v54 }
  0x6b   :  { %1030 = vlog2.f32 %v464_v56  ;;  %v269_v14 = vsub.f32 1.0, %v1278_v59  ;;  %v1414_v56 = vmul.f32 0.6931472, %v1345_v32  ;;  %v1422_v10 = vmul.f32 0.6931472, %v1367_v57 }
  0x6c   :  { %v830_v52 = vadd.f32 %v829_v23, %v828_v34  ;;  %v1417_v23 = vmul.f32 0.6931472, %v1362_v44 }
  0x6d   :  { %v1017_v38 = vpop.eup %1016 }
  0x6e   :  { %v832_v60 = vadd.f32 %v831_v26, %v830_v52  ;;  %v1019_v17 = vpop.eup %1018 }
  0x6f   :  { %v1428_v32 = vmul.f32 0.6931472, %v1019_v17 }
  0x70   :  { %v834_v49 = vadd.f32 %v833_v37, %v832_v60  ;;  %v1021_v41 = vpop.eup %1020 }
  0x71   :  { %v1023_v0 = vpop.eup %1022  ;;  %v1430_v44 = vmul.f32 0.6931472, %v1021_v41 }
  0x72   :  { %v835_v4 = vrot.slane %v834_v49, 4  ;;  %v1025_v55 = vpop.eup %1024  ;;  %v1434_v62 = vmul.f32 0.6931472, %v1023_v0 }
  0x73   :  { %v1027_v39 = vpop.eup %1026  ;;  %1709 = vst [vmem:[#allocation10_spill] sm:$0xff] %v1430_v44  ;;  %v1436_v57 = vmul.f32 0.6931472, %v1025_v55 }
  0x74   :  { %v836_v43 = vadd.f32 %v835_v4, %v834_v49  ;;  %v1029_v26 = vpop.eup %1028  ;;  %v1424_v49 = vmul.f32 0.6931472, %v1017_v38  ;;  %1710 = vst [vmem:[#allocation11_spill] sm:$0xff] %v1434_v62  ;;  %v1439_v60 = vmul.f32 0.6931472, %v1027_v39 }
  0x75   :  { %v1031_v50 = vpop.eup %1030  ;;  %1711 = vst [vmem:[#allocation12_spill] sm:$0xff] %v1436_v57 }
  0x76   :  { %v837_v4 = vrot.slane %v836_v43, 2  ;;  %1712 = vst [vmem:[#allocation13_spill] sm:$0xff] %v1439_v60  ;;  %v1446_v25 = vmul.f32 0.6931472, %v1031_v50 }
  0x78   :  { %1714 = vst [vmem:[#allocation15_spill] sm:$0xff] %v1446_v25  ;;  %v1448_v45 = vadd.f32 %v837_v4, %v836_v43 }
  0x7a   :  { %1715 = vst [vmem:[#allocation16_spill] sm:$0xff] %v1448_v45 }
  0x81   :  { %v144_v52 = vpop.permute.xlu1 %143  ;;  %v138_v37 = vpop.permute.xlu0 %137 }
  0x82   :  { %vm171_vm3 = vcmp.eq.s32.totalorder %v1382_v31, %v144_v52  ;;  %vm169_vm4 = vcmp.eq.s32.totalorder %v1382_v31, %v138_v37  ;;  %v1441_v52 = vmul.f32 0.6931472, %v1029_v26 }
  0x83   :  { %v182_v34 = vsel %vm171_vm3, 1.0, %v1696_v6  ;;  %v180_v47 = vsel %vm169_vm4, 1.0, %v1696_v6 }
  0x84   :  { %v281_v38 = vsub.f32 1.0, %v182_v34  ;;  %1713 = vst [vmem:[#allocation14_spill] sm:$0xff] %v1441_v52  ;;  %v1444_v17 = vmul.f32 %v1241_v42, %v182_v34  ;;  %v279_v41 = vsub.f32 1.0, %v180_v47  ;;  %v1450_v0 = vmul.f32 0.25, %v182_v34 }
  0x85   :  { %v147_v37 = vpop.permute.xlu1 %146  ;;  %v141_v58 = vpop.permute.xlu0 %140  ;;  %v1453_v55 = vmul.f32 %v182_v34, %v1155_v61  ;;  %v1458_v39 = vmul.f32 %v1258_v48, %v180_v47  ;;  %v1460_v42 = vmul.f32 0.25, %v180_v47  ;;  %v1469_v34 = vmul.f32 %v180_v47, %v1160_v1 }
  0x86   :  { %vm172_vm5 = vcmp.eq.s32.totalorder %v1382_v31, %v147_v37  ;;  %vm170_vm6 = vcmp.eq.s32.totalorder %v1382_v31, %v141_v58  ;;  %v1464_v43 = vmul.f32 %v281_v38, %v270_v36  ;;  %v1466_v4 = vmul.f32 0.75, %v281_v38 }
  0x87   :  { %v183_v26 = vsel %vm172_vm5, 1.0, %v1696_v6  ;;  %v181_v50 = vsel %vm170_vm6, 1.0, %v1696_v6  ;;  %v1471_v37 = vmul.f32 %v279_v41, %v268_v46  ;;  %v1473_v58 = vmul.f32 0.75, %v279_v41 }
  0x88   :  { %v282_v22 = vsub.f32 1.0, %v183_v26  ;;  %v1476_v48 = vmul.f32 %v1270_v54, %v183_v26  ;;  %v280_v29 = vsub.f32 1.0, %v181_v50  ;;  %v1478_v19 = vmul.f32 0.25, %v183_v26 }
  0x89   :  { %v153_v35 = vpop.permute.xlu1 %152  ;;  %v150_v53 = vpop.permute.xlu0 %149  ;;  %v1481_v36 = vmul.f32 %v183_v26, %v1165_v2  ;;  %v258_v46 = vmul.f32 %v1278_v59, %v181_v50  ;;  %v313_v47 = vmul.f32 0.25, %v181_v50  ;;  %v390_v26 = vmul.f32 %v181_v50, %v1176_v11 }
  0x8a   :  { %vm174_vm7 = vcmp.eq.s32.totalorder %v1382_v31, %v153_v35  ;;  %vm173_vm8 = vcmp.eq.s32.totalorder %v1382_v31, %v150_v53  ;;  %v1490_v51 = vmul.f32 %v282_v22, %v271_v9  ;;  %v1492_v12 = vmul.f32 0.75, %v282_v22 }
  0x8b   :  { %v185_v38 = vsel %vm174_vm7, 1.0, %v1696_v6  ;;  %v184_v41 = vsel %vm173_vm8, 1.0, %v1696_v6  ;;  %v291_v35 = vmul.f32 %v280_v29, %v269_v14  ;;  %v324_v53 = vmul.f32 0.75, %v280_v29 }
  0x8c   :  { %v284_v5 = vsub.f32 1.0, %v185_v38  ;;  %v1498_v30 = vmul.f32 %v1283_v3, %v185_v38  ;;  %v283_v25 = vsub.f32 1.0, %v184_v41  ;;  %v1500_v6 = vmul.f32 0.25, %v185_v38 }
  0x8d   :  { %v159_v52 = vpop.permute.xlu1 %158  ;;  %v156_v45 = vpop.permute.xlu0 %155  ;;  %v1503_v54 = vmul.f32 %v185_v38, %v1181_v15  ;;  %v261_v22 = vmul.f32 %v1296_v8, %v184_v41  ;;  %v316_v59 = vmul.f32 0.25, %v184_v41  ;;  %v1719_v9 = vmov 0.0  }
  0x8e   :  { %1716 = vst [vmem:[#allocation17_spill] sm:$0xff] %v1498_v30  ;;  %1717 = vst [vmem:[#allocation18_spill] sm:$0xff] %v1500_v6  ;;  %vm176_vm9 = vcmp.eq.s32.totalorder %v1382_v31, %v159_v52  ;;  %vm175_vm10 = vcmp.eq.s32.totalorder %v1382_v31, %v156_v45  ;;  %v1720_v50 = vsub.f32 1.0, %v1283_v3  ;;  %v1514_v57 = vmul.f32 0.75, %v284_v5 }
  0x8f   :  { %1718 = vst [vmem:[#allocation19_spill] sm:$0xff] %v1503_v54  ;;  %v187_v29 = vsel %vm176_vm9, 1.0, %v1719_v9  ;;  %v186_v14 = vsel %vm175_vm10, 1.0, %v1719_v9  ;;  %v393_v38 = vmul.f32 %v184_v41, %v1186_v20  ;;  %v1722_v52 = vsub.f32 1.0, %v1296_v8 }
  0x90   :  { %v1512_v60 = vmul.f32 %v284_v5, %v1720_v50  ;;  %v286_v62 = vsub.f32 1.0, %v187_v29  ;;  %v327_v45 = vmul.f32 0.75, %v283_v25  ;;  %v1520_v54 = vmul.f32 %v1299_v13, %v187_v29 }
  0x91   :  { %v294_v15 = vmul.f32 %v283_v25, %v1722_v52  ;;  %v285_v44 = vsub.f32 1.0, %v186_v14  ;;  %v165_v30 = vpop.permute.xlu1 %164  ;;  %v162_v6 = vpop.permute.xlu0 %161  ;;  %v1522_v16 = vmul.f32 0.25, %v187_v29  ;;  %v1525_v3 = vmul.f32 %v187_v29, %v1192_v24 }
  0x92   :  { %1721 = vst [vmem:[#allocation20_spill] sm:$0xff] %v1512_v60  ;;  %1723 = vst [vmem:[#allocation21_spill] sm:$0xff] %v1520_v54  ;;  %vm178_vm11 = vcmp.eq.s32.totalorder %v1382_v31, %v165_v30  ;;  %vm177_vm12 = vcmp.eq.s32.totalorder %v1382_v31, %v162_v6  ;;  %v1530_v5 = vmul.f32 %v1307_v21, %v186_v14  ;;  %v1532_v8 = vmul.f32 0.25, %v186_v14 }
  0x93   :  { %1724 = vst [vmem:[#allocation22_spill] sm:$0xff] %v1522_v16  ;;  %1725 = vst [vmem:[#allocation23_spill] sm:$0xff] %v1525_v3  ;;  %v1535_v25 = vsel %vm178_vm11, 1.0, %v1719_v9  ;;  %v188_v41 = vsel %vm177_vm12, 1.0, %v1719_v9  ;;  %v1727_v50 = vsub.f32 1.0, %v1299_v13  ;;  %v1542_v29 = vmul.f32 0.75, %v286_v62 }
  0x94   :  { %1726 = vst [vmem:[#allocation24_spill] sm:$0xff] %v1535_v25  ;;  %v1545_v30 = vmul.f32 %v186_v14, %v1198_v28  ;;  %v288_v6 = vsub.f32 1.0, %v1535_v25  ;;  %v1730_v16 = vsub.f32 1.0, %v1307_v21  ;;  %v1552_v3 = vmul.f32 0.75, %v285_v44 }
  0x95   :  { %v1540_v52 = vmul.f32 %v286_v62, %v1727_v50  ;;  %1729 = vst [vmem:[#allocation26_spill] sm:$0xff] %v1542_v29  ;;  %v1556_v54 = vmul.f32 %v1310_v27, %v1535_v25  ;;  %v1560_v13 = vmul.f32 %v1535_v25, %v1204_v33  ;;  %v1563_v62 = vmul.f32 %v1341_v40, %v188_v41 }
  0x96   :  { %v1550_v24 = vmul.f32 %v285_v44, %v1730_v16  ;;  %v287_v14 = vsub.f32 1.0, %v188_v41  ;;  %v1565_v50 = vmul.f32 0.25, %v188_v41  ;;  %v302_v29 = vadd.f32 %v291_v35, %v258_v46 }
  0x97   :  { %1728 = vst [vmem:[#allocation25_spill] sm:$0xff] %v1540_v52  ;;  %1731 = vst [vmem:[#allocation27_spill] sm:$0xff] %v1556_v54  ;;  %v1734_v16 = vsub.f32 1.0, %v1310_v27  ;;  %v1571_v44 = vmul.f32 0.75, %v288_v6  ;;  %v1574_v52 = vmul.f32 %v188_v41, %v1213_v63  ;;  %v1735_v54 = vmax.f32 %v1176_v11, 0.0 }
  0x98   :  { %1732 = vst [vmem:[#allocation28_spill] sm:$0xff] %v1560_v13  ;;  %1733 = vst [vmem:[#allocation29_spill] sm:$0xff] %v1563_v62  ;;  %v584_v13 = vpop.permute.xlu1 %583  ;;  %v335_v25 = vadd.f32 %v324_v53, %v313_v47  ;;  %v346_v60 = vsub.f32 1.0, %v302_v29  ;;  %v301_v62 = vadd.f32 %v1471_v37, %v1458_v39  ;;  %v1736_v46 = vmax.f32 %v1160_v1, 0.0 }
  0x99   :  { %v1569_v21 = vmul.f32 %v288_v6, %v1734_v16  ;;  %v401_v33 = vsub.f32 %v1735_v54, %v390_v26  ;;  %v334_v35 = vadd.f32 %v1473_v58, %v1460_v42  ;;  %v579_v6 = vpop.permute.xlu0 %578  ;;  %v303_v41 = vadd.f32 %v1464_v43, %v1444_v17 }
  0x9a   :  { %v400_v27 = vsub.f32 %v1736_v46, %v1469_v34  ;;  %v1737_v11 = vmax.f32 %v1155_v61, 0.0  ;;  %v305_v47 = vadd.f32 %v294_v15, %v261_v22  ;;  %v357_v53 = vmul.f32 %v346_v60, %v346_v60 }
  0x9b   :  { %v489_v54 = vadd.f32 %v1414_v56, %v401_v33  ;;  %v345_v39 = vsub.f32 1.0, %v301_v62  ;;  %v336_v1 = vadd.f32 %v1466_v4, %v1450_v0  ;;  %v347_v37 = vsub.f32 1.0, %v303_v41 }
  0x9c   :  { %v402_v26 = vsub.f32 %v1737_v11, %v1453_v55  ;;  %v488_v34 = vadd.f32 %v1417_v23, %v400_v27  ;;  %v349_v42 = vsub.f32 1.0, %v305_v47  ;;  %v1738_v58 = vmax.f32 %v1186_v20, 0.0  ;;  %v589_v16 = vpop.permute.xlu1 %588 }
  0x9d   :  { %v368_v17 = vmul.f32 %v357_v53, %v335_v25  ;;  %v356_v43 = vmul.f32 %v345_v39, %v345_v39  ;;  %v338_v61 = vadd.f32 %v327_v45, %v316_v59  ;;  %v304_v15 = vadd.f32 %v1490_v51, %v1476_v48  ;;  %v168_v56 = vpop.permute.xlu0 %167 }
  0x9e   :  { %v404_v29 = vsub.f32 %v1738_v58, %v393_v38  ;;  %v358_v60 = vmul.f32 %v347_v37, %v347_v37  ;;  %v490_v33 = vadd.f32 %v1422_v10, %v402_v26  ;;  %v360_v55 = vmul.f32 %v349_v42, %v349_v42 }
  0x9f   :  { %v566_v23 = vmul.f32 %v489_v54, %v368_v17  ;;  %v367_v4 = vmul.f32 %v356_v43, %v334_v35  ;;  %vm179_vm13 = vcmp.eq.s32.totalorder %v1382_v31, %v168_v56  ;;  %v1739_v20 = vmax.f32 %v1165_v2, 0.0 }
  0xa0   :  { %v492_v0 = vadd.f32 %v1424_v49, %v404_v29  ;;  %v369_v38 = vmul.f32 %v358_v60, %v336_v1  ;;  %v190_v59 = vsel %vm179_vm13, 1.0, %v1719_v9  ;;  %v371_v45 = vmul.f32 %v360_v55, %v338_v61  ;;  %v599_v49 = vpop.permute.xlu1 %598  ;;  %v1741_v1 = vld [vmem:[#allocation8_spill] sm:$0xff]  ;;  %v1747_v60 = vld [vmem:[#allocation29_spill] sm:$0xff]  ;;  %v1748_v55 = vld [vmem:[#allocation10_spill] sm:$0xff] }
  0xa1   :  { %v403_v22 = vsub.f32 %v1739_v20, %v1481_v36  ;;  %v348_v51 = vsub.f32 1.0, %v304_v15  ;;  %v1740_v48 = vsub.f32 1.0, %v1341_v40  ;;  %v331_v25 = vmul.f32 0.75, %v287_v14  ;;  %v594_v42 = vpop.permute.xlu0 %593  ;;  %v1746_v61 = vld [vmem:[#allocation20_spill] sm:$0xff]  ;;  %v1750_v20 = vld [vmem:[#allocation5_spill] sm:$0xff] }
  0xa2   :  { %v632_v62 = vmul.f32 %v584_v13, %v566_v23  ;;  %v565_v46 = vmul.f32 %v488_v34, %v367_v4  ;;  %v567_v27 = vmul.f32 %v490_v33, %v369_v38  ;;  %v289_v35 = vsub.f32 1.0, %v190_v59  ;;  %v1749_v4 = vld [vmem:[#allocation19_spill] sm:$0xff] }
  0xa3   :  { %v298_v10 = vmul.f32 %v287_v14, %v1740_v48  ;;  %v569_v41 = vmul.f32 %v492_v0, %v371_v45  ;;  %v337_v11 = vadd.f32 %v1492_v12, %v1478_v19  ;;  %v267_v36 = vmul.f32 %v1387_v18, %v190_v59 }
  0xa4   :  { %v631_v2 = vmul.f32 %v579_v6, %v565_v46  ;;  %v322_v26 = vmul.f32 0.25, %v190_v59  ;;  %v491_v47 = vadd.f32 %v1428_v32, %v403_v22  ;;  %v633_v53 = vmul.f32 %v589_v16, %v567_v27  ;;  %v1745_v16 = vld [vmem:[#allocation17_spill] sm:$0xff]  ;;  %v1756_v27 = vld [vmem:[#allocation6_spill] sm:$0xff] }
  0xa5   :  { %v635_v54 = vmul.f32 %v599_v49, %v569_v41  ;;  %v359_v40 = vmul.f32 %v348_v51, %v348_v51  ;;  %v307_v13 = vadd.f32 %v1550_v24, %v1530_v5  ;;  %v643_v14 = vmul.f32 %v1392_v7, %v632_v62  ;;  %v1744_v5 = vld [vmem:[#allocation18_spill] sm:$0xff]  ;;  %v1753_v62 = vld [vmem:[#allocation21_spill] sm:$0xff]  ;;  %v1755_v49 = vld [vmem:[#allocation23_spill] sm:$0xff] }
  0xa6   :  { %v642_v39 = vmul.f32 %v1392_v7, %v631_v2  ;;  %v399_v34 = vmul.f32 %v190_v59, %v1741_v1  ;;  %v1742_v12 = vmax.f32 %v1198_v28, 0.0  ;;  %v1743_v6 = vsub.f32 1.0, %v1387_v18 }
  0xa7   :  { %v333_v32 = vmul.f32 0.75, %v289_v35  ;;  %v370_v58 = vmul.f32 %v359_v40, %v337_v11  ;;  %v351_v29 = vsub.f32 1.0, %v307_v13  ;;  %v644_v17 = vmul.f32 %v1392_v7, %v633_v53  ;;  %v604_v53 = vpop.permute.xlu0 %603  ;;  %v1758_v40 = vld [vmem:[#allocation11_spill] sm:$0xff] }
  0xa8   :  { %v406_v19 = vsub.f32 %v1742_v12, %v1545_v30  ;;  %v300_v37 = vmul.f32 %v289_v35, %v1743_v6  ;;  %v340_v24 = vadd.f32 %v1552_v3, %v1532_v8  ;;  %v339_v43 = vadd.f32 %v1514_v57, %v1744_v5  ;;  %v1762_v5 = vld [vmem:[#allocation13_spill] sm:$0xff] }
  0xa9   :  { %v306_v15 = vadd.f32 %v1746_v61, %v1745_v16  ;;  %v646_v28 = vmul.f32 %v1392_v7, %v635_v54  ;;  %v568_v30 = vmul.f32 %v491_v47, %v370_v58  ;;  %v362_v18 = vmul.f32 %v351_v29, %v351_v29  ;;  %v609_v47 = vpop.permute.xlu1 %608  ;;  %v1761_v29 = vld [vmem:[#allocation12_spill] sm:$0xff] }
  0xaa   :  { %v309_v33 = vadd.f32 %v298_v10, %v1747_v60  ;;  %v653_v56 = vadd.f32 %v643_v14, %v642_v39  ;;  %v494_v0 = vadd.f32 %v1748_v55, %v406_v19  ;;  %v1751_v22 = vmax.f32 %v1750_v20, 0.0  ;;  %v1754_v10 = vld [vmem:[#allocation25_spill] sm:$0xff]  ;;  %v1765_v55 = vld [vmem:[#allocation24_spill] sm:$0xff] }
  0xab   :  { %v350_v23 = vsub.f32 1.0, %v306_v15  ;;  %v634_v8 = vmul.f32 %v594_v42, %v568_v30  ;;  %v373_v38 = vmul.f32 %v362_v18, %v340_v24  ;;  %v342_v57 = vadd.f32 %v331_v25, %v1565_v50  ;;  %v614_v20 = vpop.permute.xlu0 %613 }
  0xac   :  { %v405_v3 = vsub.f32 %v1751_v22, %v1749_v4  ;;  %v353_v59 = vsub.f32 1.0, %v309_v33  ;;  %v1752_v51 = vmax.f32 %v1213_v63, 0.0  ;;  %v308_v46 = vadd.f32 %v1754_v10, %v1753_v62  ;;  %v1759_v63 = vld [vmem:[#allocation22_spill] sm:$0xff]  ;;  %v1764_v33 = vld [vmem:[#allocation27_spill] sm:$0xff] }
  0xad   :  { %v361_v45 = vmul.f32 %v350_v23, %v350_v23  ;;  %v1757_v35 = vmax.f32 %v1756_v27, 0.0  ;;  %v654_v11 = vadd.f32 %v653_v56, %v644_v17  ;;  %v645_v2 = vmul.f32 %v1392_v7, %v634_v8  ;;  %v619_v23 = vpop.permute.xlu1 %618  ;;  %v1767_v8 = vld [vmem:[#allocation28_spill] sm:$0xff] }
  0xae   :  { %v408_v48 = vsub.f32 %v1752_v51, %v1574_v52  ;;  %v364_v50 = vmul.f32 %v353_v59, %v353_v59  ;;  %v311_v25 = vadd.f32 %v300_v37, %v267_v36  ;;  %v493_v13 = vadd.f32 %v1758_v40, %v405_v3  ;;  %v1760_v52 = vld [vmem:[#allocation26_spill] sm:$0xff]  ;;  %v1766_v3 = vld [vmem:[#allocation16_spill] sm:$0xff] }
  0xaf   :  { %v407_v41 = vsub.f32 %v1757_v35, %v1755_v49  ;;  %v372_v54 = vmul.f32 %v361_v45, %v339_v43  ;;  %v341_v14 = vadd.f32 %v1760_v52, %v1759_v63  ;;  %v352_v39 = vsub.f32 1.0, %v308_v46  ;;  %v1770_v59 = vld [vmem:[#allocation14_spill] sm:$0xff] }
  0xb0   :  { %v655_v12 = vadd.f32 %v654_v11, %v645_v2  ;;  %v571_v19 = vmul.f32 %v494_v0, %v373_v38  ;;  %v375_v6 = vmul.f32 %v364_v50, %v342_v57  ;;  %v355_v42 = vsub.f32 1.0, %v311_v25  ;;  %v1771_v2 = vld [vmem:[#allocation15_spill] sm:$0xff] }
  0xb1   :  { %v570_v58 = vmul.f32 %v493_v13, %v372_v54  ;;  %v496_v17 = vadd.f32 %v1761_v29, %v408_v48  ;;  %v363_v24 = vmul.f32 %v352_v39, %v352_v39  ;;  %v495_v16 = vadd.f32 %v1762_v5, %v407_v41 }
  0xb2   :  { %v637_v61 = vmul.f32 %v609_v47, %v571_v19  ;;  %v344_v15 = vadd.f32 %v333_v32, %v322_v26  ;;  %v366_v36 = vmul.f32 %v355_v42, %v355_v42  ;;  %v1763_v37 = vmax.f32 %v1741_v1, 0.0 }
  0xb3   :  { %v636_v30 = vmul.f32 %v604_v53, %v570_v58  ;;  %v656_v18 = vadd.f32 %v655_v12, %v646_v28  ;;  %v374_v60 = vmul.f32 %v363_v24, %v341_v14  ;;  %v310_v56 = vadd.f32 %v1569_v21, %v1764_v33  ;;  %v1768_v28 = vld [vmem:[#allocation7_spill] sm:$0xff] }
  0xb4   :  { %v410_v43 = vsub.f32 %v1763_v37, %v399_v34  ;;  %v321_v0 = vmul.f32 0.25, %v1765_v55  ;;  %v573_v4 = vmul.f32 %v496_v17, %v375_v6  ;;  %v377_v22 = vmul.f32 %v366_v36, %v344_v15 }
  0xb5   :  { %v839_v26 = vrot.slane %v1766_v3, 1  ;;  %v647_v32 = vmul.f32 %v1392_v7, %v636_v30  ;;  %v572_v1 = vmul.f32 %v495_v16, %v374_v60  ;;  %v354_v34 = vsub.f32 1.0, %v310_v56 }
  0xb6   :  { %v1769_v38 = vmax.f32 %v1768_v28, 0.0  ;;  %v648_v21 = vmul.f32 %v1392_v7, %v637_v61  ;;  %v498_v45 = vadd.f32 %v1770_v59, %v410_v43  ;;  %v343_v51 = vadd.f32 %v1571_v44, %v321_v0 }
  0xb7   :  { %v840_v48 = vadd.f32 %v839_v26, %v1766_v3  ;;  %v657_v62 = vadd.f32 %v656_v18, %v647_v32  ;;  %v639_v10 = vmul.f32 %v619_v23, %v573_v4  ;;  %v638_v46 = vmul.f32 %v614_v20, %v572_v1 }
  0xb8   :  { %v409_v57 = vsub.f32 %v1769_v38, %v1767_v8  ;;  %v365_v49 = vmul.f32 %v354_v34, %v354_v34  ;;  %v575_v27 = vmul.f32 %v498_v45, %v377_v22 }
  0xb9   :  { %842 = vst.msk [vmem:[#allocation2] sm:$0x1] %vm841_vm14, %v840_v48  ;;  %v649_v35 = vmul.f32 %v1392_v7, %v638_v46  ;;  %v658_v41 = vadd.f32 %v657_v62, %v648_v21 }
  0xba   :  { %v376_v11 = vmul.f32 %v365_v49, %v343_v51  ;;  %v497_v47 = vadd.f32 %v1771_v2, %v409_v57 }
  0xbb   :  { %1043 = shalt.err (!%p1040_p4)
}
  0xbc   :  { %s1044_s6 = scalar_lea.hbm %s1693_s5, 16 }
  0xbd   :  { %p1045_p5 = scmp.ne.s32.totalorder %s1693_s5, %s1044_s6  ;;  %p1048_p6 = scmp.lt.u32.totalorder %s1044_s6, %s1693_s5 }
  0xbf   :  { %p1050_p7 = pnand %p1048_p6, %p1045_p5 }
  0xc1   :  { %1053 = shalt.err (!%p1050_p7)
}
  0xc2   :  { %854 = dma.vmem_to_hbm [thread:$0]  %s852_s26, 16, %s1693_s5, [#allocation3]   ;;  %v629_v44 = vpop.permute.xlu1 %628  ;;  %v624_v53 = vpop.permute.xlu0 %623  ;;  %v650_v50 = vmul.f32 %v1392_v7, %v639_v10  ;;  %v659_v25 = vadd.f32 %v658_v41, %v649_v35  ;;  %vm113_vm15 = vmand %vm101_vm1, %vm102_vm2  ;;  %v574_v40 = vmul.f32 %v497_v47, %v376_v11 }
  0xc3   :  { %v641_v13 = vmul.f32 %v629_v44, %v575_v27  ;;  %v871_v14 = vsel %vm113_vm15, 1.0, %v1719_v9 }
  0xc4   :  { %v640_v63 = vmul.f32 %v624_v53, %v574_v40  ;;  %v660_v52 = vadd.f32 %v659_v25, %v650_v50 }
  0xc5   :  { %v652_v12 = vmul.f32 %v871_v14, %v641_v13 }
  0xc6   :  { %v651_v39 = vmul.f32 %v1392_v7, %v640_v63 }
  0xc8   :  { %v661_v19 = vadd.f32 %v660_v52, %v651_v39 }
  0xca   :  { %v662_v6 = vadd.f32 %v661_v19, %v652_v12 }
  0xcc   :  { %v663_v42 = vrot.slane %v662_v6, 4 }
  0xce   :  { %v664_v58 = vadd.f32 %v663_v42, %v662_v6 }
  0xd0   :  { %v665_v29 = vrot.slane %v664_v58, 2 }
  0xd2   :  { %v666_v17 = vadd.f32 %v665_v29, %v664_v58 }
  0xd4   :  { %v667_v24 = vrot.slane %v666_v17, 1 }
  0xd6   :  { %v668_v31 = vadd.f32 %v667_v24, %v666_v17 }
  0xd8   :  { %669 = vst [vmem:[%s1692_s4] sm:$0x1] %v668_v31 }
  0xd9   :  { %1054 = dma.done.wait [#allocation3], 16  }
  0xda   :  { %1055 = vsyncadd [#allocation3], 4294967280 }
  0xdb   :  { %860 = vsyncpa [#allocation3], 1 }

</bundles_post_ra>
